<compile_context>
chip_gen: v7x
topology: tpu7x:2x2x1
jax: 0.10.0
libtpu: 0.0.40
codegen_flags: <defaults>
</compile_context>

<pallas_src>
import functools

import jax
import jax.numpy as jnp
from jax.experimental import pallas as pl
from jax.experimental.pallas import tpu as pltpu

N_CLASS = 10
DATA_DIM = 784
HIDDEN = 256
XREC_PAD = ((DATA_DIM + 127) // 128) * 128      # 896 = 7*128, lane-dense store


def _round_up(n, m):
    return ((n + m - 1) // m) * m


def _fused_forward_kernel(
    temp_ref,                       # SMEM (1,1) relaxation temperature
    x_ref, g_ref, eps_ref,          # data, gumbel noise, normal noise
    wx_ref, bx_ref,                 # fused [classifier-l1 | encoder-x] (784, 512)
    cw2_ref, cb2_ref,               # classifier head
    wy_ref,                         # fused [encoder-y | decoder-y] (10, 512)
    ewms_ref, ebms_ref,             # fused encoder heads (mean|sd)
    dwz_ref, db1_ref,               # decoder layer 1 (z part + bias)
    dw2_ref, db2_ref,               # decoder output (lane-padded to 896)
    xrec_ref, pack_ref,             # outputs
):
    latent = eps_ref.shape[1]
    h_dim = db1_ref.shape[1]
    bb = x_ref.shape[0]

    inv_temp = 1.0 / temp_ref[0, 0]     # one scalar reciprocal, reused as a mul

    xb = x_ref[...].astype(jnp.bfloat16)

    # ---- fused x-LHS matmul: [classifier hidden | encoder x-contribution] ----
    h_x = (jnp.dot(xb, wx_ref[...], preferred_element_type=jnp.float32)
           + bx_ref[...])
    h_c = jnp.maximum(h_x[:, :h_dim], 0.0)       # classifier hidden (post-ReLU)
    enc_x = h_x[:, h_dim:]                       # encoder l1 x-term (+ its bias)

    log_alpha = (jnp.dot(h_c.astype(jnp.bfloat16), cw2_ref[...],
                         preferred_element_type=jnp.float32) + cb2_ref[...])

    # ---- sample y: RelaxedOneHotCategorical rsample == gumbel-softmax (f32) ----
    s = (log_alpha + g_ref[...]) * inv_temp
    s = s - jnp.max(s, axis=-1, keepdims=True)
    e = jnp.exp(s)
    y_q = e * pl.reciprocal(jnp.sum(e, axis=-1, keepdims=True))   # exact recip
    yb = y_q.astype(jnp.bfloat16)

    # ---- fused y-LHS matmul: [encoder y-contribution | decoder y-contribution] ----
    h_y = jnp.dot(yb, wy_ref[...], preferred_element_type=jnp.float32)

    # ---- encoder hidden + fused (mean | sd) head ----
    h_e = jnp.maximum(enc_x + h_y[:, :h_dim], 0.0)
    head = (jnp.dot(h_e.astype(jnp.bfloat16), ewms_ref[...],
                    preferred_element_type=jnp.float32) + ebms_ref[...])
    mu = head[:, :latent]
    sd = jax.nn.softplus(head[:, latent:])

    # ---- reparameterized z sample: z = mu + sd * eps ----
    z_q = mu + sd * eps_ref[...]

    # ---- decoder on cat([z_q, y_q], -1) + sigmoid (lane-padded output) ----
    h_d = jnp.maximum(
        jnp.dot(z_q.astype(jnp.bfloat16), dwz_ref[...],
                preferred_element_type=jnp.float32)
        + h_y[:, h_dim:] + db1_ref[...], 0.0)
    logits_x = (jnp.dot(h_d.astype(jnp.bfloat16), dw2_ref[...],
                        preferred_element_type=jnp.float32) + db2_ref[...])
    xrec_ref[...] = jax.nn.sigmoid(logits_x)

    # ---- lane-dense packed small outputs: [mu | sd | z_q | y_q | log_alpha | pad] ----
    pad = pack_ref.shape[1] - (3 * latent + 2 * N_CLASS)
    pack_ref[...] = jnp.concatenate(
        [mu, sd, z_q, y_q, log_alpha, jnp.zeros((bb, pad), jnp.float32)], axis=-1)


def model_forward(temp, x, gumbel_noise, normal_noise, params, latent_dim):
    """Fused Pallas call with a parallel batch-grid axis; weights stay resident."""
    b = x.shape[0]

    # batch blocking: rows padded to a multiple of 8, block of up to 128 rows
    b_pad8 = _round_up(b, 8)
    block_b = min(128, b_pad8)
    padded_b = _round_up(b_pad8, block_b)
    if padded_b != b:
        pad_rows = padded_b - b
        x = jnp.pad(x, ((0, pad_rows), (0, 0)))
        gumbel_noise = jnp.pad(gumbel_noise, ((0, pad_rows), (0, 0)))
        normal_noise = jnp.pad(normal_noise, ((0, pad_rows), (0, 0)))

    # params are already stored in their on-device dtypes (bf16 weights, f32 biases)
    param_list = [
        params["w_x"], params["b_x"],
        params["cw2"], params["cb2"],
        params["w_y"],
        params["ewms"], params["ebms"],
        params["dwz"], params["db1"],
        params["dw2"], params["db2"],
    ]

    temp_arr = jnp.asarray(temp, jnp.float32).reshape(1, 1)

    # packed small-output width, rounded up to a lane-dense multiple of 128
    pack_w = max(128, _round_up(3 * latent_dim + 2 * N_CLASS, 128))

    grid = (padded_b // block_b,)

    def batch_spec(width):
        return pl.BlockSpec((block_b, width), lambda i: (i, 0))

    def const_spec(shape):
        return pl.BlockSpec(shape, lambda i: (0, 0))

    in_specs = [
        pl.BlockSpec((1, 1), lambda i: (0, 0),
                     memory_space=pltpu.MemorySpace.SMEM),       # temp
        batch_spec(DATA_DIM),                                    # x
        batch_spec(N_CLASS),                                     # gumbel noise
        batch_spec(latent_dim),                                  # normal noise
    ] + [const_spec(p.shape) for p in param_list]                # resident weights

    out_specs = (
        batch_spec(XREC_PAD),                                    # x_recon (padded)
        batch_spec(pack_w),                                      # packed small outs
    )
    out_shape = (
        jax.ShapeDtypeStruct((padded_b, XREC_PAD), jnp.float32),
        jax.ShapeDtypeStruct((padded_b, pack_w), jnp.float32),
    )

    # advisory cost estimate so XLA can overlap surrounding ops with this call
    flops = 2 * padded_b * (
        DATA_DIM * 2 * HIDDEN            # fused classifier-l1 + encoder-x
        + HIDDEN * N_CLASS               # classifier head
        + N_CLASS * 2 * HIDDEN           # fused encoder-y + decoder-y
        + HIDDEN * 2 * latent_dim        # fused encoder heads
        + latent_dim * HIDDEN            # decoder l1 (z part)
        + HIDDEN * XREC_PAD)             # decoder output (lane-padded)
    transcendentals = padded_b * (N_CLASS + 2 * latent_dim + XREC_PAD)
    weight_bytes = sum(int(p.size) * p.dtype.itemsize for p in param_list)
    io_block_bytes = 4 * block_b * (DATA_DIM + N_CLASS + latent_dim
                                    + XREC_PAD + pack_w)
    io_bytes = 4 * padded_b * (DATA_DIM + N_CLASS + latent_dim
                               + XREC_PAD + pack_w)
    cost = pl.CostEstimate(flops=flops, transcendentals=transcendentals,
                           bytes_accessed=weight_bytes + io_bytes)

    # small VMEM cap (weights resident once, activation tiles double-buffered)
    vmem_limit = max(8 << 20, 3 * (weight_bytes + io_block_bytes) + (4 << 20))

    fn = pl.pallas_call(
        _fused_forward_kernel,
        out_shape=out_shape,
        grid=grid,
        in_specs=in_specs,
        out_specs=out_specs,
        compiler_params=pltpu.CompilerParams(
            dimension_semantics=("parallel",),     # shards batch over v7x's 2 TCs
            vmem_limit_bytes=int(vmem_limit)),
        cost_estimate=cost,
    )
    xrec_pad, pack = fn(temp_arr, x, gumbel_noise, normal_noise, *param_list)

    x_recon = xrec_pad[:b, :DATA_DIM]
    ld = latent_dim
    z_mean = pack[:b, 0 * ld:1 * ld]
    z_sd = pack[:b, 1 * ld:2 * ld]
    z_q = pack[:b, 2 * ld:3 * ld]
    y_q = pack[:b, 3 * ld:3 * ld + N_CLASS]
    log_alpha = pack[:b, 3 * ld + N_CLASS:3 * ld + 2 * N_CLASS]
    return x_recon, z_q, y_q, z_mean, z_sd, log_alpha


def _xavier_uniform(key, shape):
    fan_in, fan_out = shape
    bound = jnp.sqrt(6.0 / (fan_in + fan_out))
    return jax.random.uniform(key, shape, jnp.float32, -bound, bound)


def init_params(key, latent_dim):
    """Weights stored as bf16 (cast once here, outside the jitted step); biases f32.

    Fused layouts:
      w_x  = [classifier-l1 | encoder-x]   (784, 512)
      w_y  = [encoder-y     | decoder-y]   (10, 512)
      ewms = [encoder-mean  | encoder-sd]  (256, 2*latent)
      dw2/db2 lane-padded to 896 columns (pad columns are zero).
    """
    ks = jax.random.split(key, 9)
    cw1 = _xavier_uniform(ks[0], (DATA_DIM, HIDDEN))
    cw2 = _xavier_uniform(ks[1], (HIDDEN, N_CLASS))
    ewx = _xavier_uniform(ks[2], (DATA_DIM, HIDDEN))
    ewy = _xavier_uniform(ks[3], (N_CLASS, HIDDEN))
    ewm = _xavier_uniform(ks[4], (HIDDEN, latent_dim))
    ews = _xavier_uniform(ks[5], (HIDDEN, latent_dim))
    dwz = _xavier_uniform(ks[6], (latent_dim, HIDDEN))
    dwy = _xavier_uniform(ks[7], (N_CLASS, HIDDEN))
    dw2 = _xavier_uniform(ks[8], (HIDDEN, DATA_DIM))

    dw2_pad = jnp.pad(dw2, ((0, 0), (0, XREC_PAD - DATA_DIM)))

    bf16 = jnp.bfloat16
    return {
        "w_x": jnp.concatenate([cw1, ewx], axis=1).astype(bf16),
        "b_x": jnp.zeros((1, 2 * HIDDEN), jnp.float32),
        "cw2": cw2.astype(bf16),
        "cb2": jnp.zeros((1, N_CLASS), jnp.float32),
        "w_y": jnp.concatenate([ewy, dwy], axis=1).astype(bf16),
        "ewms": jnp.concatenate([ewm, ews], axis=1).astype(bf16),
        "ebms": jnp.zeros((1, 2 * latent_dim), jnp.float32),
        "dwz": dwz.astype(bf16),
        "db1": jnp.zeros((1, HIDDEN), jnp.float32),
        "dw2": dw2_pad.astype(bf16),
        "db2": jnp.zeros((1, XREC_PAD), jnp.float32),
    }


if __name__ == "__main__":
    latent_dim = 32
    batch = 16
    temp = 0.5

    key = jax.random.PRNGKey(0)
    k_param, k_x, k_g, k_e = jax.random.split(key, 4)

    params = init_params(k_param, latent_dim)
    # x plays the role of flattened binarized MNIST-like data in [0, 1)
    x = jax.random.uniform(k_x, (batch, DATA_DIM), jnp.float32)
    # sampling noise generated outside the kernel (glue); consumed inside it
    gumbel_noise = jax.random.gumbel(k_g, (batch, N_CLASS), jnp.float32)
    normal_noise = jax.random.normal(k_e, (batch, latent_dim), jnp.float32)

    fwd = jax.jit(functools.partial(model_forward, latent_dim=latent_dim))
    x_recon, z_q, y_q, z_mean, z_sd, log_alpha = fwd(
        temp, x, gumbel_noise, normal_noise, params
    )
    jax.block_until_ready((x_recon, z_q, y_q, z_mean, z_sd, log_alpha))

    assert x_recon.shape == (batch, DATA_DIM)
    assert z_q.shape == (batch, latent_dim)
    assert y_q.shape == (batch, N_CLASS)
    assert log_alpha.shape == (batch, N_CLASS)
    assert bool(jnp.all(x_recon >= 0.0) & jnp.all(x_recon <= 1.0))
    # relaxed one-hot samples lie on the simplex (softmax computed in f32, exact recip)
    assert bool(jnp.allclose(jnp.sum(y_q, axis=-1), 1.0, atol=1e-5))
    # sd is strictly positive (softplus)
    assert bool(jnp.all(z_sd > 0.0))
    print("KERNEL_OK")
</pallas_src>

<mosaic_0001>
module attributes {stable_mosaic.version = 11 : i64} {
  func.func @_fused_forward_kernel(%arg0: i32, %arg1: memref<1x1xf32, #tpu.memory_space<smem>>, %arg2: memref<16x784xf32, #tpu.memory_space<vmem>>, %arg3: memref<16x10xf32, #tpu.memory_space<vmem>>, %arg4: memref<16x32xf32, #tpu.memory_space<vmem>>, %arg5: memref<784x512xbf16, #tpu.memory_space<vmem>>, %arg6: memref<1x512xf32, #tpu.memory_space<vmem>>, %arg7: memref<256x10xbf16, #tpu.memory_space<vmem>>, %arg8: memref<1x10xf32, #tpu.memory_space<vmem>>, %arg9: memref<10x512xbf16, #tpu.memory_space<vmem>>, %arg10: memref<256x64xbf16, #tpu.memory_space<vmem>>, %arg11: memref<1x64xf32, #tpu.memory_space<vmem>>, %arg12: memref<32x256xbf16, #tpu.memory_space<vmem>>, %arg13: memref<1x256xf32, #tpu.memory_space<vmem>>, %arg14: memref<256x896xbf16, #tpu.memory_space<vmem>>, %arg15: memref<1x896xf32, #tpu.memory_space<vmem>>, %arg16: memref<16x896xf32, #tpu.memory_space<vmem>>, %arg17: memref<16x128xf32, #tpu.memory_space<vmem>>) attributes {dimension_semantics = [#tpu.dimension_semantics<parallel>], iteration_bounds = array<i64: 1>, scalar_prefetch = 0 : i64, scratch_operands = 0 : i64, tpu.core_type = #tpu.core_type<tc>, window_params = [{transform_indices = @transform_0, window_bounds = array<i64: 1, 1>}, {transform_indices = @transform_1, window_bounds = array<i64: 16, 784>}, {transform_indices = @transform_2, window_bounds = array<i64: 16, 10>}, {transform_indices = @transform_3, window_bounds = array<i64: 16, 32>}, {pipeline_mode = #tpu.pipeline_mode<synchronous>, transform_indices = @transform_4, window_bounds = array<i64: 784, 512>}, {pipeline_mode = #tpu.pipeline_mode<synchronous>, transform_indices = @transform_5, window_bounds = array<i64: 1, 512>}, {pipeline_mode = #tpu.pipeline_mode<synchronous>, transform_indices = @transform_6, window_bounds = array<i64: 256, 10>}, {pipeline_mode = #tpu.pipeline_mode<synchronous>, transform_indices = @transform_7, window_bounds = array<i64: 1, 10>}, {pipeline_mode = #tpu.pipeline_mode<synchronous>, transform_indices = @transform_8, window_bounds = array<i64: 10, 512>}, {pipeline_mode = #tpu.pipeline_mode<synchronous>, transform_indices = @transform_9, window_bounds = array<i64: 256, 64>}, {pipeline_mode = #tpu.pipeline_mode<synchronous>, transform_indices = @transform_10, window_bounds = array<i64: 1, 64>}, {pipeline_mode = #tpu.pipeline_mode<synchronous>, transform_indices = @transform_11, window_bounds = array<i64: 32, 256>}, {pipeline_mode = #tpu.pipeline_mode<synchronous>, transform_indices = @transform_12, window_bounds = array<i64: 1, 256>}, {pipeline_mode = #tpu.pipeline_mode<synchronous>, transform_indices = @transform_13, window_bounds = array<i64: 256, 896>}, {pipeline_mode = #tpu.pipeline_mode<synchronous>, transform_indices = @transform_14, window_bounds = array<i64: 1, 896>}, {transform_indices = @transform_15, window_bounds = array<i64: 16, 896>}, {transform_indices = @transform_16, window_bounds = array<i64: 16, 128>}]} {
    %c0 = arith.constant 0 : index
    %c0_0 = arith.constant 0 : index
    %0 = memref.load %arg1[%c0, %c0_0] : memref<1x1xf32, #tpu.memory_space<smem>>
    %cst = arith.constant 1.000000e+00 : f32
    %1 = arith.divf %cst, %0 : f32
    %c0_1 = arith.constant 0 : index
    %c0_2 = arith.constant 0 : index
    %2 = vector.load %arg2[%c0_1, %c0_2] : memref<16x784xf32, #tpu.memory_space<vmem>>, vector<16x784xf32>
    %3 = arith.truncf %2 : vector<16x784xf32> to vector<16x784xbf16>
    %c0_3 = arith.constant 0 : index
    %c0_4 = arith.constant 0 : index
    %4 = vector.load %arg5[%c0_3, %c0_4] : memref<784x512xbf16, #tpu.memory_space<vmem>>, vector<784x512xbf16>
    %cst_5 = arith.constant dense<0.000000e+00> : vector<16x512xf32>
    %5 = tpu.matmul %3, %4, %cst_5 {dimension_numbers = #tpu.dot_dimension_numbers<[1], [0], [0], [1], [0, 0, 1, 1], [], []>} : vector<16x784xbf16>, vector<784x512xbf16>, vector<16x512xf32> -> vector<16x512xf32>
    %c0_6 = arith.constant 0 : index
    %c0_7 = arith.constant 0 : index
    %6 = vector.load %arg6[%c0_6, %c0_7] : memref<1x512xf32, #tpu.memory_space<vmem>>, vector<1x512xf32>
    %7 = vector.broadcast %6 : vector<1x512xf32> to vector<16x512xf32>
    %8 = arith.addf %5, %7 : vector<16x512xf32>
    %9 = vector.extract_strided_slice %8 {offsets = [0, 0], sizes = [16, 256], strides = [1, 1]} : vector<16x512xf32> to vector<16x256xf32>
    %cst_8 = arith.constant 0.000000e+00 : f32
    %10 = vector.broadcast %cst_8 : f32 to vector<16x256xf32>
    %11 = arith.maximumf %9, %10 : vector<16x256xf32>
    %12 = vector.extract_strided_slice %8 {offsets = [0, 256], sizes = [16, 256], strides = [1, 1]} : vector<16x512xf32> to vector<16x256xf32>
    %13 = arith.truncf %11 : vector<16x256xf32> to vector<16x256xbf16>
    %c0_9 = arith.constant 0 : index
    %c0_10 = arith.constant 0 : index
    %14 = vector.load %arg7[%c0_9, %c0_10] : memref<256x10xbf16, #tpu.memory_space<vmem>>, vector<256x10xbf16>
    %cst_11 = arith.constant dense<0.000000e+00> : vector<16x10xf32>
    %15 = tpu.matmul %13, %14, %cst_11 {dimension_numbers = #tpu.dot_dimension_numbers<[1], [0], [0], [1], [0, 0, 1, 1], [], []>} : vector<16x256xbf16>, vector<256x10xbf16>, vector<16x10xf32> -> vector<16x10xf32>
    %c0_12 = arith.constant 0 : index
    %c0_13 = arith.constant 0 : index
    %16 = vector.load %arg8[%c0_12, %c0_13] : memref<1x10xf32, #tpu.memory_space<vmem>>, vector<1x10xf32>
    %17 = vector.broadcast %16 : vector<1x10xf32> to vector<16x10xf32>
    %18 = arith.addf %15, %17 : vector<16x10xf32>
    %c0_14 = arith.constant 0 : index
    %c0_15 = arith.constant 0 : index
    %19 = vector.load %arg3[%c0_14, %c0_15] : memref<16x10xf32, #tpu.memory_space<vmem>>, vector<16x10xf32>
    %20 = arith.addf %18, %19 : vector<16x10xf32>
    %21 = vector.broadcast %1 : f32 to vector<16x10xf32>
    %22 = arith.mulf %20, %21 : vector<16x10xf32>
    %cst_16 = arith.constant dense<0xFF800000> : vector<16xf32>
    %23 = vector.multi_reduction <maximumf>, %22, %cst_16 [1] : vector<16x10xf32> to vector<16xf32>
    %24 = vector.shape_cast %23 : vector<16xf32> to vector<16x1xf32>
    %25 = vector.broadcast %24 : vector<16x1xf32> to vector<16x10xf32>
    %26 = arith.subf %22, %25 : vector<16x10xf32>
    %27 = math.exp %26 : vector<16x10xf32>
    %cst_17 = arith.constant dense<0.000000e+00> : vector<16xf32>
    %28 = vector.multi_reduction <add>, %27, %cst_17 [1] : vector<16x10xf32> to vector<16xf32>
    %29 = vector.shape_cast %28 : vector<16xf32> to vector<16x1xf32>
    %30 = tpu.reciprocal %29 : vector<16x1xf32> -> vector<16x1xf32>
    %31 = vector.broadcast %30 : vector<16x1xf32> to vector<16x10xf32>
    %32 = arith.mulf %27, %31 : vector<16x10xf32>
    %33 = arith.truncf %32 : vector<16x10xf32> to vector<16x10xbf16>
    %c0_18 = arith.constant 0 : index
    %c0_19 = arith.constant 0 : index
    %34 = vector.load %arg9[%c0_18, %c0_19] : memref<10x512xbf16, #tpu.memory_space<vmem>>, vector<10x512xbf16>
    %cst_20 = arith.constant dense<0.000000e+00> : vector<16x512xf32>
    %35 = tpu.matmul %33, %34, %cst_20 {dimension_numbers = #tpu.dot_dimension_numbers<[1], [0], [0], [1], [0, 0, 1, 1], [], []>} : vector<16x10xbf16>, vector<10x512xbf16>, vector<16x512xf32> -> vector<16x512xf32>
    %36 = vector.extract_strided_slice %35 {offsets = [0, 0], sizes = [16, 256], strides = [1, 1]} : vector<16x512xf32> to vector<16x256xf32>
    %37 = arith.addf %12, %36 : vector<16x256xf32>
    %cst_21 = arith.constant 0.000000e+00 : f32
    %38 = vector.broadcast %cst_21 : f32 to vector<16x256xf32>
    %39 = arith.maximumf %37, %38 : vector<16x256xf32>
    %40 = arith.truncf %39 : vector<16x256xf32> to vector<16x256xbf16>
    %c0_22 = arith.constant 0 : index
    %c0_23 = arith.constant 0 : index
    %41 = vector.load %arg10[%c0_22, %c0_23] : memref<256x64xbf16, #tpu.memory_space<vmem>>, vector<256x64xbf16>
    %cst_24 = arith.constant dense<0.000000e+00> : vector<16x64xf32>
    %42 = tpu.matmul %40, %41, %cst_24 {dimension_numbers = #tpu.dot_dimension_numbers<[1], [0], [0], [1], [0, 0, 1, 1], [], []>} : vector<16x256xbf16>, vector<256x64xbf16>, vector<16x64xf32> -> vector<16x64xf32>
    %c0_25 = arith.constant 0 : index
    %c0_26 = arith.constant 0 : index
    %43 = vector.load %arg11[%c0_25, %c0_26] : memref<1x64xf32, #tpu.memory_space<vmem>>, vector<1x64xf32>
    %44 = vector.broadcast %43 : vector<1x64xf32> to vector<16x64xf32>
    %45 = arith.addf %42, %44 : vector<16x64xf32>
    %46 = vector.extract_strided_slice %45 {offsets = [0, 0], sizes = [16, 32], strides = [1, 1]} : vector<16x64xf32> to vector<16x32xf32>
    %47 = vector.extract_strided_slice %45 {offsets = [0, 32], sizes = [16, 32], strides = [1, 1]} : vector<16x64xf32> to vector<16x32xf32>
    %cst_27 = arith.constant 0.000000e+00 : f32
    %48 = vector.broadcast %cst_27 : f32 to vector<16x32xf32>
    %49 = arith.maximumf %47, %48 : vector<16x32xf32>
    %50 = vector.broadcast %cst_27 : f32 to vector<16x32xf32>
    %51 = arith.subf %47, %50 : vector<16x32xf32>
    %52 = arith.cmpf one, %51, %51 : vector<16x32xf32>
    %53 = vector.broadcast %cst_27 : f32 to vector<16x32xf32>
    %54 = arith.addf %47, %53 : vector<16x32xf32>
    %55 = math.absf %51 : vector<16x32xf32>
    %cst_28 = arith.constant 0.000000e+00 : f32
    %56 = vector.broadcast %cst_28 : f32 to vector<16x32xf32>
    %57 = arith.subf %56, %55 : vector<16x32xf32>
    %58 = math.exp %57 : vector<16x32xf32>
    %59 = math.log1p %58 : vector<16x32xf32>
    %60 = arith.addf %49, %59 : vector<16x32xf32>
    %61 = arith.select %52, %54, %60 : vector<16x32xi1>, vector<16x32xf32>
    %c0_29 = arith.constant 0 : index
    %c0_30 = arith.constant 0 : index
    %62 = vector.load %arg4[%c0_29, %c0_30] : memref<16x32xf32, #tpu.memory_space<vmem>>, vector<16x32xf32>
    %63 = arith.mulf %61, %62 : vector<16x32xf32>
    %64 = arith.addf %46, %63 : vector<16x32xf32>
    %65 = arith.truncf %64 : vector<16x32xf32> to vector<16x32xbf16>
    %c0_31 = arith.constant 0 : index
    %c0_32 = arith.constant 0 : index
    %66 = vector.load %arg12[%c0_31, %c0_32] : memref<32x256xbf16, #tpu.memory_space<vmem>>, vector<32x256xbf16>
    %cst_33 = arith.constant dense<0.000000e+00> : vector<16x256xf32>
    %67 = tpu.matmul %65, %66, %cst_33 {dimension_numbers = #tpu.dot_dimension_numbers<[1], [0], [0], [1], [0, 0, 1, 1], [], []>} : vector<16x32xbf16>, vector<32x256xbf16>, vector<16x256xf32> -> vector<16x256xf32>
    %68 = vector.extract_strided_slice %35 {offsets = [0, 256], sizes = [16, 256], strides = [1, 1]} : vector<16x512xf32> to vector<16x256xf32>
    %69 = arith.addf %67, %68 : vector<16x256xf32>
    %c0_34 = arith.constant 0 : index
    %c0_35 = arith.constant 0 : index
    %70 = vector.load %arg13[%c0_34, %c0_35] : memref<1x256xf32, #tpu.memory_space<vmem>>, vector<1x256xf32>
    %71 = vector.broadcast %70 : vector<1x256xf32> to vector<16x256xf32>
    %72 = arith.addf %69, %71 : vector<16x256xf32>
    %cst_36 = arith.constant 0.000000e+00 : f32
    %73 = vector.broadcast %cst_36 : f32 to vector<16x256xf32>
    %74 = arith.maximumf %72, %73 : vector<16x256xf32>
    %75 = arith.truncf %74 : vector<16x256xf32> to vector<16x256xbf16>
    %c0_37 = arith.constant 0 : index
    %c0_38 = arith.constant 0 : index
    %76 = vector.load %arg14[%c0_37, %c0_38] : memref<256x896xbf16, #tpu.memory_space<vmem>>, vector<256x896xbf16>
    %cst_39 = arith.constant dense<0.000000e+00> : vector<16x896xf32>
    %77 = tpu.matmul %75, %76, %cst_39 {dimension_numbers = #tpu.dot_dimension_numbers<[1], [0], [0], [1], [0, 0, 1, 1], [], []>} : vector<16x256xbf16>, vector<256x896xbf16>, vector<16x896xf32> -> vector<16x896xf32>
    %c0_40 = arith.constant 0 : index
    %c0_41 = arith.constant 0 : index
    %78 = vector.load %arg15[%c0_40, %c0_41] : memref<1x896xf32, #tpu.memory_space<vmem>>, vector<1x896xf32>
    %79 = vector.broadcast %78 : vector<1x896xf32> to vector<16x896xf32>
    %80 = arith.addf %77, %79 : vector<16x896xf32>
    %81 = arith.negf %80 : vector<16x896xf32>
    %82 = math.exp %81 : vector<16x896xf32>
    %cst_42 = arith.constant 1.000000e+00 : f32
    %83 = vector.broadcast %cst_42 : f32 to vector<16x896xf32>
    %84 = arith.addf %83, %82 : vector<16x896xf32>
    %85 = arith.divf %83, %84 : vector<16x896xf32>
    %c0_43 = arith.constant 0 : index
    %c0_44 = arith.constant 0 : index
    %86 = vector.load %arg16[%c0_43, %c0_44] : memref<16x896xf32, #tpu.memory_space<vmem>>, vector<16x896xf32>
    tpu.vector_store %arg16[%c0_43, %c0_44], %85 {strides = array<i32>} : memref<16x896xf32, #tpu.memory_space<vmem>>, vector<16x896xf32>,
    %cst_45 = arith.constant 0.000000e+00 : f32
    %87 = vector.broadcast %cst_45 : f32 to vector<16x12xf32>
    %88 = tpu.concatenate %46, %61, %64, %32, %18, %87 in 1 : vector<16x32xf32>, vector<16x32xf32>, vector<16x32xf32>, vector<16x10xf32>, vector<16x10xf32>, vector<16x12xf32> -> vector<16x128xf32>
    %c0_46 = arith.constant 0 : index
    %c0_47 = arith.constant 0 : index
    %89 = vector.load %arg17[%c0_46, %c0_47] : memref<16x128xf32, #tpu.memory_space<vmem>>, vector<16x128xf32>
    tpu.vector_store %arg17[%c0_46, %c0_47], %88 {strides = array<i32>} : memref<16x128xf32, #tpu.memory_space<vmem>>, vector<16x128xf32>,
    return
  }
  func.func @transform_0(%arg0: i32) -> (i32, i32) {
    %c0_i32 = arith.constant 0 : i32
    %c0_i32_0 = arith.constant 0 : i32
    %c0_i32_1 = arith.constant 0 : i32
    return %c0_i32, %c0_i32_0 : i32, i32
  }
  func.func @transform_1(%arg0: i32) -> (i32, i32) {
    %c0_i32 = arith.constant 0 : i32
    %c0_i32_0 = arith.constant 0 : i32
    return %arg0, %c0_i32 : i32, i32
  }
  func.func @transform_2(%arg0: i32) -> (i32, i32) {
    %c0_i32 = arith.constant 0 : i32
    %c0_i32_0 = arith.constant 0 : i32
    return %arg0, %c0_i32 : i32, i32
  }
  func.func @transform_3(%arg0: i32) -> (i32, i32) {
    %c0_i32 = arith.constant 0 : i32
    %c0_i32_0 = arith.constant 0 : i32
    return %arg0, %c0_i32 : i32, i32
  }
  func.func @transform_4(%arg0: i32) -> (i32, i32) {
    %c0_i32 = arith.constant 0 : i32
    %c0_i32_0 = arith.constant 0 : i32
    %c0_i32_1 = arith.constant 0 : i32
    return %c0_i32, %c0_i32_0 : i32, i32
  }
  func.func @transform_5(%arg0: i32) -> (i32, i32) {
    %c0_i32 = arith.constant 0 : i32
    %c0_i32_0 = arith.constant 0 : i32
    %c0_i32_1 = arith.constant 0 : i32
    return %c0_i32, %c0_i32_0 : i32, i32
  }
  func.func @transform_6(%arg0: i32) -> (i32, i32) {
    %c0_i32 = arith.constant 0 : i32
    %c0_i32_0 = arith.constant 0 : i32
    %c0_i32_1 = arith.constant 0 : i32
    return %c0_i32, %c0_i32_0 : i32, i32
  }
  func.func @transform_7(%arg0: i32) -> (i32, i32) {
    %c0_i32 = arith.constant 0 : i32
    %c0_i32_0 = arith.constant 0 : i32
    %c0_i32_1 = arith.constant 0 : i32
    return %c0_i32, %c0_i32_0 : i32, i32
  }
  func.func @transform_8(%arg0: i32) -> (i32, i32) {
    %c0_i32 = arith.constant 0 : i32
    %c0_i32_0 = arith.constant 0 : i32
    %c0_i32_1 = arith.constant 0 : i32
    return %c0_i32, %c0_i32_0 : i32, i32
  }
  func.func @transform_9(%arg0: i32) -> (i32, i32) {
    %c0_i32 = arith.constant 0 : i32
    %c0_i32_0 = arith.constant 0 : i32
    %c0_i32_1 = arith.constant 0 : i32
    return %c0_i32, %c0_i32_0 : i32, i32
  }
  func.func @transform_10(%arg0: i32) -> (i32, i32) {
    %c0_i32 = arith.constant 0 : i32
    %c0_i32_0 = arith.constant 0 : i32
    %c0_i32_1 = arith.constant 0 : i32
    return %c0_i32, %c0_i32_0 : i32, i32
  }
  func.func @transform_11(%arg0: i32) -> (i32, i32) {
    %c0_i32 = arith.constant 0 : i32
    %c0_i32_0 = arith.constant 0 : i32
    %c0_i32_1 = arith.constant 0 : i32
    return %c0_i32, %c0_i32_0 : i32, i32
  }
  func.func @transform_12(%arg0: i32) -> (i32, i32) {
    %c0_i32 = arith.constant 0 : i32
    %c0_i32_0 = arith.constant 0 : i32
    %c0_i32_1 = arith.constant 0 : i32
    return %c0_i32, %c0_i32_0 : i32, i32
  }
  func.func @transform_13(%arg0: i32) -> (i32, i32) {
    %c0_i32 = arith.constant 0 : i32
    %c0_i32_0 = arith.constant 0 : i32
    %c0_i32_1 = arith.constant 0 : i32
    return %c0_i32, %c0_i32_0 : i32, i32
  }
  func.func @transform_14(%arg0: i32) -> (i32, i32) {
    %c0_i32 = arith.constant 0 : i32
    %c0_i32_0 = arith.constant 0 : i32
    %c0_i32_1 = arith.constant 0 : i32
    return %c0_i32, %c0_i32_0 : i32, i32
  }
  func.func @transform_15(%arg0: i32) -> (i32, i32) {
    %c0_i32 = arith.constant 0 : i32
    %c0_i32_0 = arith.constant 0 : i32
    return %arg0, %c0_i32 : i32, i32
  }
  func.func @transform_16(%arg0: i32) -> (i32, i32) {
    %c0_i32 = arith.constant 0 : i32
    %c0_i32_0 = arith.constant 0 : i32
    return %arg0, %c0_i32 : i32, i32
  }
}

</mosaic_0001>

<bundles_post_ra>
// kernel: model_forward.1
= control target key start
LH: loop header
LB: loop body
LE: loop exit
PB: predicated region body
PF: predicated region fallthrough
CT: control target
= control target key end

     0   :  { %s5016_s0 = inlined_call_operand.<no memory space> [shape: f32[1,1], index: 0, kind: input, shape index: {}]   ;;  %s5017_s1 = inlined_call_operand.vmem [shape: f32[16,784], index: 1, kind: input, shape index: {}]   ;;  %s5018_s2 = inlined_call_operand.vmem [shape: f32[16,10], index: 2, kind: input, shape index: {}]   ;;  %s5019_s3 = inlined_call_operand.vmem [shape: f32[16,32], index: 3, kind: input, shape index: {}]   ;;  %s5020_s4 = inlined_call_operand.hbm [shape: bf16[784,512], index: 4, kind: input, shape index: {}]   ;;  %s5021_s5 = inlined_call_operand.vmem [shape: f32[1,512], index: 5, kind: input, shape index: {}]   ;;  %s5022_s6 = inlined_call_operand.vmem [shape: bf16[256,10], index: 6, kind: input, shape index: {}]   ;;  %s5023_s7 = inlined_call_operand.vmem [shape: f32[1,10], index: 7, kind: input, shape index: {}]   ;;  %s5024_s8 = inlined_call_operand.vmem [shape: bf16[10,512], index: 8, kind: input, shape index: {}]   ;;  %s5025_s9 = inlined_call_operand.vmem [shape: bf16[256,64], index: 9, kind: input, shape index: {}]   ;;  %s5026_s10 = inlined_call_operand.vmem [shape: f32[1,64], index: 10, kind: input, shape index: {}]   ;;  %s5027_s11 = inlined_call_operand.vmem [shape: bf16[32,256], index: 11, kind: input, shape index: {}]   ;;  %s5028_s12 = inlined_call_operand.vmem [shape: f32[1,256], index: 12, kind: input, shape index: {}]   ;;  %s5029_s13 = inlined_call_operand.hbm [shape: bf16[256,896], index: 13, kind: input, shape index: {}]   ;;  %s5030_s14 = inlined_call_operand.vmem [shape: f32[1,896], index: 14, kind: input, shape index: {}]   ;;  %s5031_s15 = inlined_call_operand.hbm [shape: f32[16,896], index: 15, kind: output, shape index: {0}]   ;;  %s5032_s16 = inlined_call_operand.vmem [shape: f32[16,128], index: 16, kind: output, shape index: {1}]  }
   0x1   :  { %5033 = sst [smem:[#allocation12_spill]] %s5016_s0 }
   0x2   :  { %23 = vsyncpa [#allocation4], 0 }
   0x3   :  { %24 = vsyncpa [#allocation7], 0 }
   0x4   :  { %25 = vsyncpa [#allocation5], 0  ;;  %s4535_s21 = smov [#allocation3]   ;;  %s4463_s25 = scalar_lea.hbm %s5020_s4, 25088 }
   0x5   :  { %s39_s22 = sshll.u32 %s4535_s21, 4  ;;  %p4464_p0 = scmp.ne.s32.totalorder %s5020_s4, %s4463_s25  ;;  %s40_s22 = int_to_ptr.vmem [resolvable:$true] %s39_s22 }
   0x6   :  { %p4467_p1 = scmp.lt.u32.totalorder %s4463_s25, %s5020_s4 }
   0x8   :  { %p4469_p2 = pnand %p4467_p1, %p4464_p0 }
   0xa   :  { %4472 = shalt.err (!%p4469_p2)
}
   0xb   :  { %s4473_s30 = scalar_lea.vmem %s40_s22, 25088  ;;  %p4478_p4 = scmp.lt.s32.totalorder %s40_s22, %s40_s22 }
   0xc   :  { %p4474_p3 = scmp.ne.s32.totalorder %s40_s22, %s4473_s30  ;;  %p4479_p5 = scmp.lt.s32.totalorder %s4473_s30, %s4473_s30 }
   0xe   :  { %p4480_p6 = por %p4479_p5, %p4478_p4 }
  0x10   :  { %p4481_p7 = pnand %p4480_p6, %p4474_p3 }
  0x12   :  { %4484 = shalt.err (!%p4481_p7)
}
  0x13   :  { %s4536_s0 = smov 256   ;;  %s4537_s17 = smov 16  }
  0x14   :  { %45 = dma.hbm_to_vmem [thread:$0]  %s5020_s4, 25088, %s40_s22, [#allocation4], %s4536_s0, %s4536_s0, %s4537_s17  }
  0x15   :  { %s4538_s20 = smov [#allocation6]   ;;  %s4485_s25 = scalar_lea.hbm %s5029_s13, 14336 }
  0x16   :  { %s67_s21 = sshll.u32 %s4538_s20, 4  ;;  %p4486_p8 = scmp.ne.s32.totalorder %s5029_s13, %s4485_s25  ;;  %s68_s21 = int_to_ptr.vmem [resolvable:$true] %s67_s21 }
  0x17   :  { %p4489_p9 = scmp.lt.u32.totalorder %s4485_s25, %s5029_s13 }
  0x19   :  { %p4491_p10 = pnand %p4489_p9, %p4486_p8 }
  0x1b   :  { %4494 = shalt.err (!%p4491_p10)
}
  0x1c   :  { %s4495_s30 = scalar_lea.vmem %s68_s21, 14336  ;;  %p4500_p12 = scmp.lt.s32.totalorder %s68_s21, %s68_s21 }
  0x1d   :  { %p4496_p11 = scmp.ne.s32.totalorder %s68_s21, %s4495_s30  ;;  %p4501_p13 = scmp.lt.s32.totalorder %s4495_s30, %s4495_s30 }
  0x1f   :  { %p4502_p0 = por %p4501_p13, %p4500_p12 }
  0x21   :  { %p4503_p1 = pnand %p4502_p0, %p4496_p11 }
  0x23   :  { %4506 = shalt.err (!%p4503_p1)
}
  0x24   :  { %s4539_s4 = smov 448   ;;  %s4540_s22 = smov 28  }
  0x25   :  { %73 = dma.hbm_to_vmem [thread:$0]  %s5029_s13, 14336, %s68_s21, [#allocation7], %s4539_s4, %s4539_s4, %s4540_s22  }
  0x26   :  { %4529 = dma.done.wait [#allocation4], 25088  }
  0x27   :  { %4530 = vsyncadd [#allocation4], 4294942208 }
  0x28   :  { %4531 = dma.done.wait [#allocation7], 14336  }
  0x29   :  { %4532 = vsyncadd [#allocation7], 4294952960  ;;  %v3891_v0 = vld [vmem:[#allocation3 + $0x4] ss:$16 sps:$4 sm:$0xff]   ;;  %v3893_v1 = vld [vmem:[#allocation3] ss:$16 sps:$4 sm:$0xff]  }
  0x2a   :  { %1310 = vmatprep.subr.bf16.mxu0 %v3891_v0  ;;  %v3894_v2 = vld [vmem:[#allocation3 + $0x24] ss:$16 sps:$4 sm:$0xff]   ;;  %v3896_v3 = vld [vmem:[#allocation3 + $0x20] ss:$16 sps:$4 sm:$0xff]   ;;  %v88_v13 = vld [vmem:[%s5017_s1 + $0x8] sm:$0xff]  ;;  %v4541_v44 = vmov 0  }
  0x2b   :  { %1311 = vmatpush1.bf16.msra.mxu0 %v3893_v1  ;;  %v3897_v4 = vld [vmem:[#allocation3 + $0x44] ss:$16 sps:$4 sm:$0xff]   ;;  %v3899_v5 = vld [vmem:[#allocation3 + $0x40] ss:$16 sps:$4 sm:$0xff]   ;;  %v94_v37 = vld [vmem:[%s5017_s1 + $0x38] sm:$0xff]  ;;  %1471 = vmatprep.mubr.bf16.mxu1 %v4541_v44  ;;  %vm1306_vm0 = vcmask 130048  }
  0x2c   :  { %1312 = vmatprep.subr.bf16.mxu0 %v3894_v2  ;;  %v3900_v6 = vld [vmem:[#allocation3 + $0x64] ss:$16 sps:$4 sm:$0xff]   ;;  %v3902_v7 = vld [vmem:[#allocation3 + $0x60] ss:$16 sps:$4 sm:$0xff]   ;;  %v90_v38 = vld [vmem:[%s5017_s1 + $0x18] sm:$0xff]  ;;  %s5034_s27 = sld [smem:[#allocation12_spill]] }
  0x2d   :  { %v3903_v8 = vld [vmem:[#allocation3 + $0x84] ss:$16 sps:$4 sm:$0xff]   ;;  %v3905_v9 = vld [vmem:[#allocation3 + $0x80] ss:$16 sps:$4 sm:$0xff]   ;;  %v100_v50 = vld [vmem:[%s5017_s1 + $0x68] sm:$0xff]  ;;  %vm1843_vm1 = vcmask 80896  }
  0x2e   :  { %v3906_v10 = vld [vmem:[#allocation3 + $0xa4] ss:$16 sps:$4 sm:$0xff]   ;;  %v3908_v11 = vld [vmem:[#allocation3 + $0xa0] ss:$16 sps:$4 sm:$0xff]   ;;  %vm1890_vm2 = vcmask 1044480   ;;  %s4542_s20 = smov 32  }
  0x2f   :  { %1313 = vmatpush1.bf16.msra.mxu0 %v3896_v3  ;;  %v3909_v12 = vld [vmem:[#allocation3 + $0xc4] ss:$16 sps:$4 sm:$0xff]   ;;  %v3911_v16 = vld [vmem:[#allocation3 + $0xc0] ss:$16 sps:$4 sm:$0xff]   ;;  %s4543_s24 = smov 96   ;;  %vm2258_vm7 = vcmask 261120  }
  0x30   :  { %1314 = vmatprep.subr.bf16.mxu0 %v3897_v4  ;;  %v95_v14 = vld [vmem:[%s5017_s1 + $0x40] sm:$0xff]  ;;  %v97_v39 = vld [vmem:[%s5017_s1 + $0x50] sm:$0xff]  ;;  %vm3362_vm8 = vcmask 523264   ;;  %vm3365_vm9 = vcmask 785408   ;;  %vm3368_vm10 = vcmask 867328   ;;  %vm3371_vm11 = vcmask 949248  }
  0x31   :  { %v4664_v15 = vpack.c.bf16 %v95_v14, %v88_v13  ;;  %v3912_v17 = vld [vmem:[#allocation3 + $0xe4] ss:$16 sps:$4 sm:$0xff]   ;;  %v3914_v18 = vld [vmem:[#allocation3 + $0xe0] ss:$16 sps:$4 sm:$0xff]   ;;  %v4681_v42 = vpack.c.bf16 %v97_v39, %v90_v38 }
  0x32   :  { %v3915_v19 = vld [vmem:[#allocation3 + $0x104] ss:$16 sps:$4 sm:$0xff]   ;;  %v3917_v20 = vld [vmem:[#allocation3 + $0x100] ss:$16 sps:$4 sm:$0xff]  }
  0x33   :  { %1315 = vmatpush1.bf16.msra.mxu0 %v3899_v5  ;;  %1342 = vmatprep.mubr.bf16.mxu0 %v4664_v15  ;;  %v3918_v21 = vld [vmem:[#allocation3 + $0x124] ss:$16 sps:$4 sm:$0xff]   ;;  %v3920_v22 = vld [vmem:[#allocation3 + $0x120] ss:$16 sps:$4 sm:$0xff]  }
  0x34   :  { %1316 = vmatprep.subr.bf16.mxu0 %v3900_v6  ;;  %v3921_v23 = vld [vmem:[#allocation3 + $0x144] ss:$16 sps:$4 sm:$0xff]   ;;  %v3923_v24 = vld [vmem:[#allocation3 + $0x140] ss:$16 sps:$4 sm:$0xff]  }
  0x35   :  { %v3924_v25 = vld [vmem:[#allocation3 + $0x164] ss:$16 sps:$4 sm:$0xff]   ;;  %v3926_v26 = vld [vmem:[#allocation3 + $0x160] ss:$16 sps:$4 sm:$0xff]  }
  0x36   :  { %v3927_v27 = vld [vmem:[#allocation3 + $0x184] ss:$16 sps:$4 sm:$0xff]   ;;  %v3929_v28 = vld [vmem:[#allocation3 + $0x180] ss:$16 sps:$4 sm:$0xff]  }
  0x37   :  { %1317 = vmatpush1.bf16.msra.mxu0 %v3902_v7  ;;  %v3930_v29 = vld [vmem:[#allocation3 + $0x1a4] ss:$16 sps:$4 sm:$0xff]   ;;  %v3932_v30 = vld [vmem:[#allocation3 + $0x1a0] ss:$16 sps:$4 sm:$0xff]  }
  0x38   :  { %1318 = vmatprep.subr.bf16.mxu0 %v3903_v8  ;;  %v3933_v31 = vld [vmem:[#allocation3 + $0x1c4] ss:$16 sps:$4 sm:$0xff]   ;;  %v3935_v32 = vld [vmem:[#allocation3 + $0x1c0] ss:$16 sps:$4 sm:$0xff]  }
  0x39   :  { %v3936_v33 = vld [vmem:[#allocation3 + $0x1e4] ss:$16 sps:$4 sm:$0xff]   ;;  %v3938_v34 = vld [vmem:[#allocation3 + $0x1e0] ss:$16 sps:$4 sm:$0xff]  }
  0x3a   :  { %v3941_v35 = vld [vmem:[#allocation3 + $0x204] ss:$16 sps:$4 sm:$0xff]   ;;  %v3939_v41 = vld [vmem:[#allocation3 + $0x200] ss:$16 sps:$4 sm:$0xff]  }
  0x3b   :  { %1319 = vmatpush1.bf16.msra.mxu0 %v3905_v9  ;;  %v87_v36 = vld [vmem:[%s5017_s1] sm:$0xff]  ;;  %v93_v49 = vld [vmem:[%s5017_s1 + $0x30] sm:$0xff] }
  0x3c   :  { %1320 = vmatprep.subr.bf16.mxu0 %v3906_v10  ;;  %v4679_v40 = vpack.c.bf16 %v94_v37, %v87_v36  ;;  %v3944_v43 = vld [vmem:[#allocation3 + $0x224] ss:$16 sps:$4 sm:$0xff]   ;;  %v3942_v46 = vld [vmem:[#allocation3 + $0x220] ss:$16 sps:$4 sm:$0xff]   ;;  %v4692_v51 = vpack.c.bf16 %v100_v50, %v93_v49 }
  0x3d   :  { %v4032_v45 = vld [vmem:[#allocation3 + $0x604] ss:$16 sps:$4 sm:$0xff]   ;;  %v4037_v47 = vld [vmem:[#allocation3 + $0x600] ss:$16 sps:$4 sm:$0xff]  }
  0x3e   :  { %v3947_v48 = vld [vmem:[#allocation3 + $0x244] ss:$16 sps:$4 sm:$0xff]   ;;  %1439 = vmatprep.subr.bf16.mxu1 %v4032_v45  ;;  %v3945_v52 = vld [vmem:[#allocation3 + $0x240] ss:$16 sps:$4 sm:$0xff]  }
  0x3f   :  { %1321 = vmatpush1.bf16.msra.mxu0 %v3908_v11  ;;  %1440 = vmatpush1.bf16.msra.mxu1 %v4037_v47  ;;  %v3950_v53 = vld [vmem:[#allocation3 + $0x264] ss:$16 sps:$4 sm:$0xff]   ;;  %v3948_v54 = vld [vmem:[#allocation3 + $0x260] ss:$16 sps:$4 sm:$0xff]  }
  0x40   :  { %1322 = vmatprep.subr.bf16.mxu0 %v3909_v12  ;;  %v3953_v55 = vld [vmem:[#allocation3 + $0x284] ss:$16 sps:$4 sm:$0xff]   ;;  %v3951_v56 = vld [vmem:[#allocation3 + $0x280] ss:$16 sps:$4 sm:$0xff]  }
  0x41   :  { %v3956_v57 = vld [vmem:[#allocation3 + $0x2a4] ss:$16 sps:$4 sm:$0xff]   ;;  %v3954_v58 = vld [vmem:[#allocation3 + $0x2a0] ss:$16 sps:$4 sm:$0xff]  }
  0x42   :  { %3594 = vmatmul.mubr.msk.bf16.vlgmr.msra.gmra.mrb[0].mxu1 %vm1306_vm0, %v4692_v51  ;;  %v3959_v59 = vld [vmem:[#allocation3 + $0x2c4] ss:$16 sps:$4 sm:$0xff]   ;;  %v3957_v60 = vld [vmem:[#allocation3 + $0x2c0] ss:$16 sps:$4 sm:$0xff]  }
  0x43   :  { %1323 = vmatpush1.bf16.msra.mxu0 %v3911_v16  ;;  %1514 = vmatprep.mubr.bf16.mxu1 %v4664_v15  ;;  %v3962_v61 = vld [vmem:[#allocation3 + $0x2e4] ss:$16 sps:$4 sm:$0xff]   ;;  %v3960_v62 = vld [vmem:[#allocation3 + $0x2e0] ss:$16 sps:$4 sm:$0xff]   ;;  %v96_v16 = vld [vmem:[%s5017_s1 + $0x48] sm:$0xff] }
  0x44   :  { %1324 = vmatprep.subr.bf16.mxu0 %v3912_v17  ;;  %v3965_v63 = vld [vmem:[#allocation3 + $0x304] ss:$16 sps:$4 sm:$0xff]   ;;  %v3963_v0 = vld [vmem:[#allocation3 + $0x300] ss:$16 sps:$4 sm:$0xff]  }
  0x45   :  { %v3968_v1 = vld [vmem:[#allocation3 + $0x324] ss:$16 sps:$4 sm:$0xff]   ;;  %v3966_v2 = vld [vmem:[#allocation3 + $0x320] ss:$16 sps:$4 sm:$0xff]  }
  0x46   :  { %v3971_v3 = vld [vmem:[#allocation3 + $0x344] ss:$16 sps:$4 sm:$0xff]   ;;  %v3969_v4 = vld [vmem:[#allocation3 + $0x340] ss:$16 sps:$4 sm:$0xff]  }
  0x47   :  { %1325 = vmatpush1.bf16.msra.mxu0 %v3914_v18  ;;  %v3974_v5 = vld [vmem:[#allocation3 + $0x364] ss:$16 sps:$4 sm:$0xff]   ;;  %v3972_v6 = vld [vmem:[#allocation3 + $0x360] ss:$16 sps:$4 sm:$0xff]   ;;  %v92_v18 = vld [vmem:[%s5017_s1 + $0x28] sm:$0xff] }
  0x48   :  { %1326 = vmatprep.subr.bf16.mxu0 %v3915_v19  ;;  %v3977_v7 = vld [vmem:[#allocation3 + $0x384] ss:$16 sps:$4 sm:$0xff]   ;;  %v3975_v8 = vld [vmem:[#allocation3 + $0x380] ss:$16 sps:$4 sm:$0xff]  }
  0x49   :  { %v3980_v9 = vld [vmem:[#allocation3 + $0x3a4] ss:$16 sps:$4 sm:$0xff]   ;;  %v3978_v10 = vld [vmem:[#allocation3 + $0x3a0] ss:$16 sps:$4 sm:$0xff]  }
  0x4a   :  { %v3983_v11 = vld [vmem:[#allocation3 + $0x3c4] ss:$16 sps:$4 sm:$0xff]   ;;  %v3981_v12 = vld [vmem:[#allocation3 + $0x3c0] ss:$16 sps:$4 sm:$0xff]  }
  0x4b   :  { %1327 = vmatpush1.bf16.msra.mxu0 %v3917_v20  ;;  %v3986_v13 = vld [vmem:[#allocation3 + $0x3e4] ss:$16 sps:$4 sm:$0xff]   ;;  %v3984_v14 = vld [vmem:[#allocation3 + $0x3e0] ss:$16 sps:$4 sm:$0xff]  }
  0x4c   :  { %1328 = vmatprep.subr.bf16.mxu0 %v3918_v21  ;;  %v89_v15 = vld [vmem:[%s5017_s1 + $0x10] sm:$0xff]  ;;  %v99_v19 = vld [vmem:[%s5017_s1 + $0x60] sm:$0xff] }
  0x4d   :  { %v3989_v17 = vld [vmem:[#allocation3 + $0x404] ss:$16 sps:$4 sm:$0xff]   ;;  %v3987_v20 = vld [vmem:[#allocation3 + $0x400] ss:$16 sps:$4 sm:$0xff]   ;;  %v4709_v21 = vpack.c.bf16 %v96_v16, %v89_v15  ;;  %v84_v16 = vstv %s5034_s27 }
  0x4e   :  { %v4008_v36 = vld [vmem:[#allocation3 + $0x4e0] ss:$16 sps:$4 sm:$0xff]   ;;  %v4013_v37 = vld [vmem:[#allocation3 + $0x504] ss:$16 sps:$4 sm:$0xff]   ;;  %4389 = vrcp.f32 %v84_v16 }
  0x4f   :  { %1329 = vmatpush1.bf16.msra.mxu0 %v3920_v22  ;;  %v3992_v22 = vld [vmem:[#allocation3 + $0x424] ss:$16 sps:$4 sm:$0xff]   ;;  %v4011_v38 = vld [vmem:[#allocation3 + $0x500] ss:$16 sps:$4 sm:$0xff]  }
  0x50   :  { %1330 = vmatprep.subr.bf16.mxu0 %v3921_v23  ;;  %v4711_v23 = vpack.c.bf16 %v99_v19, %v92_v18  ;;  %v4016_v39 = vld [vmem:[#allocation3 + $0x524] ss:$16 sps:$4 sm:$0xff]   ;;  %v4017_v45 = vld [vmem:[#allocation3 + $0x540] ss:$16 sps:$4 sm:$0xff]   ;;  %v306_v18 = vlaneseq }
  0x51   :  { %v4020_v47 = vld [vmem:[#allocation3 + $0x560] ss:$16 sps:$4 sm:$0xff]   ;;  %v4028_v50 = vld [vmem:[#allocation3 + $0x5a4] ss:$16 sps:$4 sm:$0xff]  }
  0x52   :  { %v4023_v49 = vld [vmem:[#allocation3 + $0x580] ss:$16 sps:$4 sm:$0xff]   ;;  %v4775_v19 = vshrl.u32 %v306_v18, 7 }
  0x53   :  { %1331 = vmatpush1.bf16.msra.mxu0 %v3923_v24  ;;  %v3990_v24 = vld [vmem:[#allocation3 + $0x420] ss:$16 sps:$4 sm:$0xff]  }
  0x54   :  { %1332 = vmatprep.subr.bf16.mxu0 %v3924_v25  ;;  %v3995_v25 = vld [vmem:[#allocation3 + $0x444] ss:$16 sps:$4 sm:$0xff]  }
  0x57   :  { %1333 = vmatpush1.bf16.msra.mxu0 %v3926_v26  ;;  %v3993_v26 = vld [vmem:[#allocation3 + $0x440] ss:$16 sps:$4 sm:$0xff]  }
  0x58   :  { %1334 = vmatprep.subr.bf16.mxu0 %v3927_v27  ;;  %v3998_v27 = vld [vmem:[#allocation3 + $0x464] ss:$16 sps:$4 sm:$0xff]  }
  0x5b   :  { %1335 = vmatpush1.bf16.msra.mxu0 %v3929_v28  ;;  %v3996_v28 = vld [vmem:[#allocation3 + $0x460] ss:$16 sps:$4 sm:$0xff]  }
  0x5c   :  { %1336 = vmatprep.subr.bf16.mxu0 %v3930_v29  ;;  %v4001_v29 = vld [vmem:[#allocation3 + $0x484] ss:$16 sps:$4 sm:$0xff]  }
  0x5f   :  { %1337 = vmatpush1.bf16.msra.mxu0 %v3932_v30  ;;  %v3999_v30 = vld [vmem:[#allocation3 + $0x480] ss:$16 sps:$4 sm:$0xff]  }
  0x60   :  { %1338 = vmatprep.subr.bf16.mxu0 %v3933_v31  ;;  %v4004_v31 = vld [vmem:[#allocation3 + $0x4a4] ss:$16 sps:$4 sm:$0xff]  }
  0x63   :  { %1339 = vmatpush1.bf16.msra.mxu0 %v3935_v32  ;;  %v4002_v32 = vld [vmem:[#allocation3 + $0x4a0] ss:$16 sps:$4 sm:$0xff]  }
  0x64   :  { %1340 = vmatprep.subr.bf16.mxu0 %v3936_v33  ;;  %v4007_v33 = vld [vmem:[#allocation3 + $0x4c4] ss:$16 sps:$4 sm:$0xff]  }
  0x67   :  { %1341 = vmatpush1.bf16.msra.mxu0 %v3938_v34  ;;  %v4005_v34 = vld [vmem:[#allocation3 + $0x4c0] ss:$16 sps:$4 sm:$0xff]  }
  0x68   :  { %1353 = vmatprep.subr.bf16.mxu0 %v3941_v35  ;;  %v4010_v35 = vld [vmem:[#allocation3 + $0x4e4] ss:$16 sps:$4 sm:$0xff]  }
  0x6a   :  { %1343 = vmatmul.mubr.bf16.vlgmr.msra.gmra.mrb[0].mxu0 %v4679_v40 }
  0x6b   :  { %1354 = vmatpush1.bf16.msra.mxu0 %v3939_v41  ;;  %1385 = vmatprep.mubr.bf16.mxu0 %v4681_v42  ;;  %v4014_v41 = vld [vmem:[#allocation3 + $0x520] ss:$16 sps:$4 sm:$0xff]  }
  0x6c   :  { %1355 = vmatprep.subr.bf16.mxu0 %v3944_v43  ;;  %v4019_v43 = vld [vmem:[#allocation3 + $0x544] ss:$16 sps:$4 sm:$0xff]  }
  0x6f   :  { %1356 = vmatpush1.bf16.msra.mxu0 %v3942_v46  ;;  %v4022_v46 = vld [vmem:[#allocation3 + $0x564] ss:$16 sps:$4 sm:$0xff]  }
  0x70   :  { %1357 = vmatprep.subr.bf16.mxu0 %v3947_v48  ;;  %v4025_v48 = vld [vmem:[#allocation3 + $0x584] ss:$16 sps:$4 sm:$0xff]  }
  0x73   :  { %1358 = vmatpush1.bf16.msra.mxu0 %v3945_v52  ;;  %v4026_v52 = vld [vmem:[#allocation3 + $0x5a0] ss:$16 sps:$4 sm:$0xff]  }
  0x74   :  { %1359 = vmatprep.subr.bf16.mxu0 %v3950_v53  ;;  %v4031_v53 = vld [vmem:[#allocation3 + $0x5c4] ss:$16 sps:$4 sm:$0xff]  }
  0x77   :  { %1360 = vmatpush1.bf16.msra.mxu0 %v3948_v54  ;;  %v4029_v54 = vld [vmem:[#allocation3 + $0x5c0] ss:$16 sps:$4 sm:$0xff]  }
  0x78   :  { %1361 = vmatprep.subr.bf16.mxu0 %v3953_v55  ;;  %v4036_v55 = vld [vmem:[#allocation3 + $0x5e4] ss:$16 sps:$4 sm:$0xff]  }
  0x7b   :  { %1362 = vmatpush1.bf16.msra.mxu0 %v3951_v56  ;;  %v4034_v56 = vld [vmem:[#allocation3 + $0x5e0] ss:$16 sps:$4 sm:$0xff]  }
  0x7c   :  { %1363 = vmatprep.subr.bf16.mxu0 %v3956_v57  ;;  %v91_v57 = vld [vmem:[%s5017_s1 + $0x20] sm:$0xff] }
  0x7f   :  { %1364 = vmatpush1.bf16.msra.mxu0 %v3954_v58  ;;  %v98_v58 = vld [vmem:[%s5017_s1 + $0x58] sm:$0xff] }
  0x80   :  { %1365 = vmatprep.subr.bf16.mxu0 %v3959_v59  ;;  %v4038_v59 = vld [vmem:[%s5022_s6 + $0x40] sm:$0xff]  }
  0x83   :  { %1366 = vmatpush1.bf16.msra.mxu0 %v3957_v60  ;;  %v4724_v60 = vpack.c.bf16 %v98_v58, %v91_v57  ;;  %v4068_v57 = vld [vmem:[#allocation3 + $0x8c] ss:$16 sps:$4 sm:$0xff]   ;;  %v4066_v58 = vld [vmem:[#allocation3 + $0x88] ss:$16 sps:$4 sm:$0xff]  }
  0x84   :  { %1367 = vmatprep.subr.bf16.mxu0 %v3962_v61  ;;  %v4039_v61 = vld [vmem:[%s5022_s6] sm:$0xff]  }
  0x87   :  { %1368 = vmatpush1.bf16.msra.mxu0 %v3960_v62  ;;  %v4040_v62 = vld [vmem:[%s5022_s6 + $0x48] sm:$0xff]  }
  0x88   :  { %1369 = vmatprep.subr.bf16.mxu0 %v3965_v63  ;;  %v4041_v63 = vld [vmem:[%s5022_s6 + $0x8] sm:$0xff]  }
  0x8b   :  { %1370 = vmatpush1.bf16.msra.mxu0 %v3963_v0  ;;  %v4042_v0 = vld [vmem:[%s5022_s6 + $0x50] sm:$0xff]  }
  0x8c   :  { %1371 = vmatprep.subr.bf16.mxu0 %v3968_v1  ;;  %v4043_v1 = vld [vmem:[%s5022_s6 + $0x10] sm:$0xff]  }
  0x8f   :  { %1372 = vmatpush1.bf16.msra.mxu0 %v3966_v2  ;;  %v4044_v2 = vld [vmem:[%s5022_s6 + $0x58] sm:$0xff]  }
  0x90   :  { %1373 = vmatprep.subr.bf16.mxu0 %v3971_v3  ;;  %v4045_v3 = vld [vmem:[%s5022_s6 + $0x18] sm:$0xff]  }
  0x93   :  { %1374 = vmatpush1.bf16.msra.mxu0 %v3969_v4  ;;  %v4046_v4 = vld [vmem:[%s5022_s6 + $0x60] sm:$0xff]  }
  0x94   :  { %1375 = vmatprep.subr.bf16.mxu0 %v3974_v5  ;;  %v4047_v5 = vld [vmem:[%s5022_s6 + $0x20] sm:$0xff]  }
  0x97   :  { %1376 = vmatpush1.bf16.msra.mxu0 %v3972_v6  ;;  %v4048_v6 = vld [vmem:[%s5022_s6 + $0x68] sm:$0xff]  }
  0x98   :  { %1377 = vmatprep.subr.bf16.mxu0 %v3977_v7  ;;  %v4049_v7 = vld [vmem:[%s5022_s6 + $0x28] sm:$0xff]  }
  0x9b   :  { %1378 = vmatpush1.bf16.msra.mxu0 %v3975_v8  ;;  %v4050_v8 = vld [vmem:[%s5022_s6 + $0x70] sm:$0xff]  }
  0x9c   :  { %1379 = vmatprep.subr.bf16.mxu0 %v3980_v9  ;;  %v4051_v9 = vld [vmem:[%s5022_s6 + $0x30] sm:$0xff]  }
  0x9f   :  { %1380 = vmatpush1.bf16.msra.mxu0 %v3978_v10 }
  0xa0   :  { %1381 = vmatprep.subr.bf16.mxu0 %v3983_v11 }
  0xa3   :  { %1382 = vmatpush1.bf16.msra.mxu0 %v3981_v12  ;;  %v4052_v12 = vld [vmem:[%s5022_s6 + $0x78] sm:$0xff]  }
  0xa4   :  { %1383 = vmatprep.subr.bf16.mxu0 %v3986_v13 }
  0xa7   :  { %1384 = vmatpush1.bf16.msra.mxu0 %v3984_v14  ;;  %v4053_v14 = vld [vmem:[%s5022_s6 + $0x38] sm:$0xff]  }
  0xa8   :  { %1396 = vmatprep.subr.bf16.mxu0 %v3989_v17  ;;  %v4390_v17 = vpop.eup %4389 }
  0xa9   :  { %3875 = vpush %v4390_v17 }
  0xaa   :  { %1386 = vmatmul.mubr.bf16.vlgmr.msra.gmra.mrb[0].mxu0 %v4709_v21 }
  0xab   :  { %1397 = vmatpush1.bf16.msra.mxu0 %v3987_v20  ;;  %1428 = vmatprep.mubr.bf16.mxu0 %v4711_v23  ;;  %v4778_v20 = vsub.s32 0, %v4775_v19 }
  0xac   :  { %1398 = vmatprep.subr.bf16.mxu0 %v3992_v22  ;;  %v4783_v22 = vld [vmem:[%s5021_s5] sm:$0xf] }
  0xaf   :  { %1399 = vmatpush1.bf16.msra.mxu0 %v3990_v24  ;;  %v4786_v24 = vsub.s32 1, %v4775_v19 }
  0xb0   :  { %1400 = vmatprep.subr.bf16.mxu0 %v3995_v25  ;;  %v309_v25 = vrot.slane %v4783_v22, %v4778_v20 }
  0xb3   :  { %1401 = vmatpush1.bf16.msra.mxu0 %v3993_v26  ;;  %v313_v26 = vrot.slane %v4783_v22, %v4786_v24 }
  0xb4   :  { %1402 = vmatprep.subr.bf16.mxu0 %v3998_v27 }
  0xb7   :  { %1403 = vmatpush1.bf16.msra.mxu0 %v3996_v28 }
  0xb8   :  { %1404 = vmatprep.subr.bf16.mxu0 %v4001_v29 }
  0xbb   :  { %1405 = vmatpush1.bf16.msra.mxu0 %v3999_v30 }
  0xbc   :  { %1406 = vmatprep.subr.bf16.mxu0 %v4004_v31 }
  0xbf   :  { %1407 = vmatpush1.bf16.msra.mxu0 %v4002_v32 }
  0xc0   :  { %1408 = vmatprep.subr.bf16.mxu0 %v4007_v33 }
  0xc3   :  { %1409 = vmatpush1.bf16.msra.mxu0 %v4005_v34 }
  0xc4   :  { %1410 = vmatprep.subr.bf16.mxu0 %v4010_v35 }
  0xc7   :  { %1411 = vmatpush1.bf16.msra.mxu0 %v4008_v36 }
  0xc8   :  { %1412 = vmatprep.subr.bf16.mxu0 %v4013_v37 }
  0xcb   :  { %1413 = vmatpush1.bf16.msra.mxu0 %v4011_v38 }
  0xcc   :  { %1414 = vmatprep.subr.bf16.mxu0 %v4016_v39 }
  0xcf   :  { %1415 = vmatpush1.bf16.msra.mxu0 %v4014_v41 }
  0xd0   :  { %1416 = vmatprep.subr.bf16.mxu0 %v4019_v43 }
  0xd3   :  { %1417 = vmatpush1.bf16.msra.mxu0 %v4017_v45 }
  0xd4   :  { %1418 = vmatprep.subr.bf16.mxu0 %v4022_v46 }
  0xd7   :  { %1419 = vmatpush1.bf16.msra.mxu0 %v4020_v47 }
  0xd8   :  { %1420 = vmatprep.subr.bf16.mxu0 %v4025_v48  ;;  %v4054_v48 = vld [vmem:[#allocation3 + $0x8] ss:$16 sps:$4 sm:$0xff]  }
  0xda   :  { %s3876_s30 = spop %3875 }
  0xdb   :  { %1421 = vmatpush1.bf16.msra.mxu0 %v4023_v49  ;;  %v4056_v49 = vld [vmem:[#allocation3 + $0xc] ss:$16 sps:$4 sm:$0xff]   ;;  %v1840_v16 = vstv %s3876_s30 }
  0xdc   :  { %1422 = vmatprep.subr.bf16.mxu0 %v4028_v50  ;;  %v4059_v50 = vld [vmem:[#allocation3 + $0x2c] ss:$16 sps:$4 sm:$0xff]   ;;  %1482 = vmatprep.subr.bf16.mxu1 %v4056_v49 }
  0xdd   :  { %1483 = vmatpush1.bf16.msra.mxu1 %v4054_v48  ;;  %v4105_v48 = vld [vmem:[#allocation3 + $0x228] ss:$16 sps:$4 sm:$0xff]   ;;  %v4110_v49 = vld [vmem:[#allocation3 + $0x24c] ss:$16 sps:$4 sm:$0xff]  }
  0xde   :  { %1484 = vmatprep.subr.bf16.mxu1 %v4059_v50  ;;  %v4108_v50 = vld [vmem:[#allocation3 + $0x248] ss:$16 sps:$4 sm:$0xff]  }
  0xdf   :  { %1423 = vmatpush1.bf16.msra.mxu0 %v4026_v52  ;;  %v4057_v52 = vld [vmem:[#allocation3 + $0x28] ss:$16 sps:$4 sm:$0xff]  }
  0xe0   :  { %1424 = vmatprep.subr.bf16.mxu0 %v4031_v53  ;;  %v4062_v53 = vld [vmem:[#allocation3 + $0x4c] ss:$16 sps:$4 sm:$0xff]  }
  0xe1   :  { %1485 = vmatpush1.bf16.msra.mxu1 %v4057_v52  ;;  %v4113_v52 = vld [vmem:[#allocation3 + $0x26c] ss:$16 sps:$4 sm:$0xff]  }
  0xe2   :  { %1486 = vmatprep.subr.bf16.mxu1 %v4062_v53  ;;  %v4111_v53 = vld [vmem:[#allocation3 + $0x268] ss:$16 sps:$4 sm:$0xff]  }
  0xe3   :  { %1425 = vmatpush1.bf16.msra.mxu0 %v4029_v54  ;;  %v4060_v54 = vld [vmem:[#allocation3 + $0x48] ss:$16 sps:$4 sm:$0xff]  }
  0xe4   :  { %1426 = vmatprep.subr.bf16.mxu0 %v4036_v55  ;;  %v4065_v55 = vld [vmem:[#allocation3 + $0x6c] ss:$16 sps:$4 sm:$0xff]  }
  0xe5   :  { %1487 = vmatpush1.bf16.msra.mxu1 %v4060_v54  ;;  %v4116_v54 = vld [vmem:[#allocation3 + $0x28c] ss:$16 sps:$4 sm:$0xff]  }
  0xe6   :  { %1488 = vmatprep.subr.bf16.mxu1 %v4065_v55  ;;  %v4114_v55 = vld [vmem:[#allocation3 + $0x288] ss:$16 sps:$4 sm:$0xff]  }
  0xe7   :  { %1427 = vmatpush1.bf16.msra.mxu0 %v4034_v56  ;;  %v4063_v56 = vld [vmem:[#allocation3 + $0x68] ss:$16 sps:$4 sm:$0xff]  }
  0xe8   :  { %3769 = vmatprep.subr.bf16.mxu0 %v4038_v59  ;;  %v4071_v59 = vld [vmem:[#allocation3 + $0xac] ss:$16 sps:$4 sm:$0xff]  }
  0xe9   :  { %1489 = vmatpush1.bf16.msra.mxu1 %v4063_v56  ;;  %v4119_v56 = vld [vmem:[#allocation3 + $0x2ac] ss:$16 sps:$4 sm:$0xff]  }
  0xea   :  { %1429 = vmatmul.mubr.bf16.vlgmr.msra.gmra.mrb[0].mxu0 %v4724_v60  ;;  %1490 = vmatprep.subr.bf16.mxu1 %v4068_v57  ;;  %v4122_v57 = vld [vmem:[#allocation3 + $0x2cc] ss:$16 sps:$4 sm:$0xff]  }
  0xeb   :  { %3770 = vmatpush3.bf16.msra.mxu0 %v4039_v61  ;;  %v4069_v61 = vld [vmem:[#allocation3 + $0xa8] ss:$16 sps:$4 sm:$0xff]  }
  0xec   :  { %3771 = vmatprep.subr.bf16.mxu0 %v4040_v62  ;;  %v4074_v62 = vld [vmem:[#allocation3 + $0xcc] ss:$16 sps:$4 sm:$0xff]  }
  0xed   :  { %1491 = vmatpush1.bf16.msra.mxu1 %v4066_v58  ;;  %v4125_v58 = vld [vmem:[#allocation3 + $0x2ec] ss:$16 sps:$4 sm:$0xff]  }
  0xee   :  { %1492 = vmatprep.subr.bf16.mxu1 %v4071_v59  ;;  %v4123_v59 = vld [vmem:[#allocation3 + $0x2e8] ss:$16 sps:$4 sm:$0xff]  }
  0xef   :  { %3772 = vmatpush3.bf16.msra.mxu0 %v4041_v63  ;;  %v4072_v63 = vld [vmem:[#allocation3 + $0xc8] ss:$16 sps:$4 sm:$0xff]  }
  0xf0   :  { %3773 = vmatprep.subr.bf16.mxu0 %v4042_v0  ;;  %v4077_v0 = vld [vmem:[#allocation3 + $0xec] ss:$16 sps:$4 sm:$0xff]  }
  0xf1   :  { %1493 = vmatpush1.bf16.msra.mxu1 %v4069_v61  ;;  %v4128_v61 = vld [vmem:[#allocation3 + $0x30c] ss:$16 sps:$4 sm:$0xff]  }
  0xf2   :  { %1494 = vmatprep.subr.bf16.mxu1 %v4074_v62  ;;  %v4126_v62 = vld [vmem:[#allocation3 + $0x308] ss:$16 sps:$4 sm:$0xff]  }
  0xf3   :  { %3774 = vmatpush3.bf16.msra.mxu0 %v4043_v1  ;;  %v4075_v1 = vld [vmem:[#allocation3 + $0xe8] ss:$16 sps:$4 sm:$0xff]  }
  0xf4   :  { %3775 = vmatprep.subr.bf16.mxu0 %v4044_v2  ;;  %v4080_v2 = vld [vmem:[#allocation3 + $0x10c] ss:$16 sps:$4 sm:$0xff]  }
  0xf5   :  { %1495 = vmatpush1.bf16.msra.mxu1 %v4072_v63  ;;  %v4131_v63 = vld [vmem:[#allocation3 + $0x32c] ss:$16 sps:$4 sm:$0xff]  }
  0xf6   :  { %1496 = vmatprep.subr.bf16.mxu1 %v4077_v0  ;;  %v4129_v0 = vld [vmem:[#allocation3 + $0x328] ss:$16 sps:$4 sm:$0xff]  }
  0xf7   :  { %3776 = vmatpush3.bf16.msra.mxu0 %v4045_v3  ;;  %v4078_v3 = vld [vmem:[#allocation3 + $0x108] ss:$16 sps:$4 sm:$0xff]  }
  0xf8   :  { %3777 = vmatprep.subr.bf16.mxu0 %v4046_v4  ;;  %v4083_v4 = vld [vmem:[#allocation3 + $0x12c] ss:$16 sps:$4 sm:$0xff]  }
  0xf9   :  { %1497 = vmatpush1.bf16.msra.mxu1 %v4075_v1  ;;  %v4134_v1 = vld [vmem:[#allocation3 + $0x34c] ss:$16 sps:$4 sm:$0xff]  }
  0xfa   :  { %1498 = vmatprep.subr.bf16.mxu1 %v4080_v2  ;;  %v4132_v2 = vld [vmem:[#allocation3 + $0x348] ss:$16 sps:$4 sm:$0xff]  }
  0xfb   :  { %3778 = vmatpush3.bf16.msra.mxu0 %v4047_v5  ;;  %v4081_v5 = vld [vmem:[#allocation3 + $0x128] ss:$16 sps:$4 sm:$0xff]  }
  0xfc   :  { %3779 = vmatprep.subr.bf16.mxu0 %v4048_v6 }
  0xfd   :  { %1499 = vmatpush1.bf16.msra.mxu1 %v4078_v3  ;;  %v4137_v3 = vld [vmem:[#allocation3 + $0x36c] ss:$16 sps:$4 sm:$0xff]  }
  0xfe   :  { %1500 = vmatprep.subr.bf16.mxu1 %v4083_v4  ;;  %v4135_v4 = vld [vmem:[#allocation3 + $0x368] ss:$16 sps:$4 sm:$0xff]  }
  0xff   :  { %3780 = vmatpush3.bf16.msra.mxu0 %v4049_v7  ;;  %v3596_v7 = vld [vmem:[%s5023_s7] ss:$0 sm:$0xff] }
 0x100   :  { %3781 = vmatprep.subr.bf16.mxu0 %v4050_v8 }
 0x101   :  { %1501 = vmatpush1.bf16.msra.mxu1 %v4081_v5  ;;  %v4140_v5 = vld [vmem:[#allocation3 + $0x38c] ss:$16 sps:$4 sm:$0xff]  }
 0x103   :  { %3782 = vmatpush3.bf16.msra.mxu0 %v4051_v9 }
 0x104   :  { %3783 = vmatprep.subr.bf16.mxu0 %v4052_v12  ;;  %v1836_v12 = vld [vmem:[%s5018_s2] sm:$0xff] }
 0x107   :  { %3784 = vmatpush3.bf16.msra.mxu0 %v4053_v14 }
 0x115   :  { %v1473_v10 = vpop.f32.mrb[0].mxu1 }
 0x116   :  { %v1475_v11 = vpop.f32.mrb[1].mxu1 }
 0x117   :  { %v1477_v13 = vpop.f32.mrb[2].mxu1 }
 0x118   :  { %v1479_v15 = vpop.f32.mrb[3].mxu1 }
 0x1bd   :  { %v1430_v27 = vpop.f32.mrb[0].mxu0 }
 0x1be   :  { %v3835_v28 = vadd.f32 %v1430_v27, %v309_v25  ;;  %v1432_v29 = vpop.f32.mrb[1].mxu0 }
 0x1bf   :  { %v3837_v30 = vadd.f32 %v1432_v29, %v313_v26  ;;  %v1434_v31 = vpop.f32.mrb[2].mxu0 }
 0x1c0   :  { %v3836_v32 = vadd.f32 %v3835_v28, %v1473_v10  ;;  %v3839_v33 = vadd.f32 %v1434_v31, %v309_v25  ;;  %v1436_v34 = vpop.f32.mrb[3].mxu0  ;;  %v4084_v31 = vld [vmem:[#allocation3 + $0x148] ss:$16 sps:$4 sm:$0xff]  }
 0x1c1   :  { %v3838_v35 = vadd.f32 %v3837_v30, %v1475_v11  ;;  %v3841_v36 = vadd.f32 %v1436_v34, %v313_v26  ;;  %v4086_v30 = vld [vmem:[#allocation3 + $0x14c] ss:$16 sps:$4 sm:$0xff]  }
 0x1c2   :  { %v3840_v37 = vadd.f32 %v3839_v33, %v1477_v13  ;;  %v1654_v39 = vmax.f32 %v3836_v32, 0.0  ;;  %1502 = vmatprep.subr.bf16.mxu1 %v4086_v30  ;;  %v4089_v32 = vld [vmem:[#allocation3 + $0x16c] ss:$16 sps:$4 sm:$0xff]   ;;  %v4087_v33 = vld [vmem:[#allocation3 + $0x168] ss:$16 sps:$4 sm:$0xff]  }
 0x1c3   :  { %v3842_v38 = vadd.f32 %v3841_v36, %v1479_v15  ;;  %v1655_v43 = vmax.f32 %v3838_v35, 0.0  ;;  %v1837_v15 = vld [vmem:[%s5018_s2 + $0x8] sm:$0xff]  ;;  %1503 = vmatpush1.bf16.msra.mxu1 %v4084_v31 }
 0x1c4   :  { %v1656_v41 = vmax.f32 %v3840_v37, 0.0  ;;  %1504 = vmatprep.subr.bf16.mxu1 %v4089_v32  ;;  %v4092_v34 = vld [vmem:[#allocation3 + $0x18c] ss:$16 sps:$4 sm:$0xff]   ;;  %v4090_v35 = vld [vmem:[#allocation3 + $0x188] ss:$16 sps:$4 sm:$0xff]  }
 0x1c5   :  { %v1657_v45 = vmax.f32 %v3842_v38, 0.0  ;;  %v4095_v36 = vld [vmem:[#allocation3 + $0x1ac] ss:$16 sps:$4 sm:$0xff]   ;;  %v4093_v37 = vld [vmem:[#allocation3 + $0x1a8] ss:$16 sps:$4 sm:$0xff]  }
 0x1c6   :  { %v1658_v46 = vpack.c.bf16 %v1656_v41, %v1654_v39  ;;  %v4098_v38 = vld [vmem:[#allocation3 + $0x1cc] ss:$16 sps:$4 sm:$0xff]   ;;  %v4096_v39 = vld [vmem:[#allocation3 + $0x1c8] ss:$16 sps:$4 sm:$0xff]  }
 0x1c7   :  { %v1659_v47 = vpack.c.bf16 %v1657_v45, %v1655_v43  ;;  %1505 = vmatpush1.bf16.msra.mxu1 %v4087_v33  ;;  %v4101_v41 = vld [vmem:[#allocation3 + $0x1ec] ss:$16 sps:$4 sm:$0xff]   ;;  %v4099_v43 = vld [vmem:[#allocation3 + $0x1e8] ss:$16 sps:$4 sm:$0xff]  }
 0x1c8   :  { %1506 = vmatprep.subr.bf16.mxu1 %v4092_v34  ;;  %v4104_v45 = vld [vmem:[#allocation3 + $0x20c] ss:$16 sps:$4 sm:$0xff]   ;;  %v4159_v30 = vld [vmem:[#allocation3 + $0x468] ss:$16 sps:$4 sm:$0xff]  }
 0x1c9   :  { %1827 = vmatprep.mubr.bf16.mxu0 %v1659_v47  ;;  %v4107_v47 = vld [vmem:[#allocation3 + $0x22c] ss:$16 sps:$4 sm:$0xff]   ;;  %v4162_v32 = vld [vmem:[#allocation3 + $0x488] ss:$16 sps:$4 sm:$0xff]  }
 0x1ca   :  { %1828 = vmatmul.mubr.bf16.vlgmr.msra.gmra.mrb[4].mxu0 %v1658_v46  ;;  %v4102_v46 = vld [vmem:[#allocation3 + $0x208] ss:$16 sps:$4 sm:$0xff]   ;;  %v4164_v31 = vld [vmem:[#allocation3 + $0x48c] ss:$16 sps:$4 sm:$0xff]  }
 0x1cb   :  { %1507 = vmatpush1.bf16.msra.mxu1 %v4090_v35  ;;  %v4167_v33 = vld [vmem:[#allocation3 + $0x4ac] ss:$16 sps:$4 sm:$0xff]  }
 0x1cc   :  { %1508 = vmatprep.subr.bf16.mxu1 %v4095_v36  ;;  %v4170_v34 = vld [vmem:[#allocation3 + $0x4cc] ss:$16 sps:$4 sm:$0xff]   ;;  %v4171_v36 = vld [vmem:[#allocation3 + $0x4e8] ss:$16 sps:$4 sm:$0xff]  }
 0x1cd   :  { %v4173_v35 = vld [vmem:[#allocation3 + $0x4ec] ss:$16 sps:$4 sm:$0xff]  }
 0x1cf   :  { %1509 = vmatpush1.bf16.msra.mxu1 %v4093_v37  ;;  %v4176_v37 = vld [vmem:[#allocation3 + $0x50c] ss:$16 sps:$4 sm:$0xff]  }
 0x1d0   :  { %1510 = vmatprep.subr.bf16.mxu1 %v4098_v38  ;;  %v4174_v38 = vld [vmem:[#allocation3 + $0x508] ss:$16 sps:$4 sm:$0xff]  }
 0x1d3   :  { %1511 = vmatpush1.bf16.msra.mxu1 %v4096_v39  ;;  %v4179_v39 = vld [vmem:[#allocation3 + $0x52c] ss:$16 sps:$4 sm:$0xff]  }
 0x1d4   :  { %1512 = vmatprep.subr.bf16.mxu1 %v4101_v41  ;;  %v4177_v41 = vld [vmem:[#allocation3 + $0x528] ss:$16 sps:$4 sm:$0xff]  }
 0x1d7   :  { %1513 = vmatpush1.bf16.msra.mxu1 %v4099_v43  ;;  %v4182_v43 = vld [vmem:[#allocation3 + $0x54c] ss:$16 sps:$4 sm:$0xff]  }
 0x1d8   :  { %1525 = vmatprep.subr.bf16.mxu1 %v4104_v45  ;;  %v4180_v45 = vld [vmem:[#allocation3 + $0x548] ss:$16 sps:$4 sm:$0xff]  }
 0x1da   :  { %1515 = vmatmul.mubr.bf16.vlgmr.msra.gmra.mrb[4].mxu1 %v4679_v40  ;;  %v4117_v40 = vld [vmem:[#allocation3 + $0x2a8] ss:$16 sps:$4 sm:$0xff]  }
 0x1db   :  { %1526 = vmatpush1.bf16.msra.mxu1 %v4102_v46  ;;  %1557 = vmatprep.mubr.bf16.mxu1 %v4681_v42  ;;  %v4120_v42 = vld [vmem:[#allocation3 + $0x2c8] ss:$16 sps:$4 sm:$0xff]  }
 0x1dc   :  { %1527 = vmatprep.subr.bf16.mxu1 %v4107_v47  ;;  %v4185_v47 = vld [vmem:[#allocation3 + $0x56c] ss:$16 sps:$4 sm:$0xff]  }
 0x1df   :  { %1528 = vmatpush1.bf16.msra.mxu1 %v4105_v48 }
 0x1e0   :  { %1529 = vmatprep.subr.bf16.mxu1 %v4110_v49 }
 0x1e3   :  { %1530 = vmatpush1.bf16.msra.mxu1 %v4108_v50  ;;  %v4183_v50 = vld [vmem:[#allocation3 + $0x568] ss:$16 sps:$4 sm:$0xff]  }
 0x1e4   :  { %1531 = vmatprep.subr.bf16.mxu1 %v4113_v52 }
 0x1e7   :  { %1532 = vmatpush1.bf16.msra.mxu1 %v4111_v53  ;;  %v4188_v53 = vld [vmem:[#allocation3 + $0x58c] ss:$16 sps:$4 sm:$0xff]  }
 0x1e8   :  { %1533 = vmatprep.subr.bf16.mxu1 %v4116_v54 }
 0x1eb   :  { %1534 = vmatpush1.bf16.msra.mxu1 %v4114_v55 }
 0x1ec   :  { %1535 = vmatprep.subr.bf16.mxu1 %v4119_v56  ;;  %v4186_v56 = vld [vmem:[#allocation3 + $0x588] ss:$16 sps:$4 sm:$0xff]  }
 0x1ef   :  { %1536 = vmatpush1.bf16.msra.mxu1 %v4117_v40  ;;  %v4191_v40 = vld [vmem:[#allocation3 + $0x5ac] ss:$16 sps:$4 sm:$0xff]  }
 0x1f0   :  { %1537 = vmatprep.subr.bf16.mxu1 %v4122_v57  ;;  %v4189_v57 = vld [vmem:[#allocation3 + $0x5a8] ss:$16 sps:$4 sm:$0xff]  }
 0x1f3   :  { %1538 = vmatpush1.bf16.msra.mxu1 %v4120_v42  ;;  %v4194_v42 = vld [vmem:[#allocation3 + $0x5cc] ss:$16 sps:$4 sm:$0xff]  }
 0x1f4   :  { %1539 = vmatprep.subr.bf16.mxu1 %v4125_v58  ;;  %v4192_v58 = vld [vmem:[#allocation3 + $0x5c8] ss:$16 sps:$4 sm:$0xff]  }
 0x1f7   :  { %1540 = vmatpush1.bf16.msra.mxu1 %v4123_v59 }
 0x1f8   :  { %1541 = vmatprep.subr.bf16.mxu1 %v4128_v61  ;;  %v4197_v61 = vld [vmem:[#allocation3 + $0x5ec] ss:$16 sps:$4 sm:$0xff]  }
 0x1fb   :  { %1542 = vmatpush1.bf16.msra.mxu1 %v4126_v62 }
 0x1fc   :  { %1543 = vmatprep.subr.bf16.mxu1 %v4131_v63 }
 0x1ff   :  { %1544 = vmatpush1.bf16.msra.mxu1 %v4129_v0  ;;  %v4200_v0 = vld [vmem:[#allocation3 + $0x60c] ss:$16 sps:$4 sm:$0xff]  }
 0x200   :  { %1545 = vmatprep.subr.bf16.mxu1 %v4134_v1  ;;  %v4198_v1 = vld [vmem:[#allocation3 + $0x608] ss:$16 sps:$4 sm:$0xff]  }
 0x203   :  { %1546 = vmatpush1.bf16.msra.mxu1 %v4132_v2  ;;  %v4201_v2 = vld [vmem:[%s5024_s8 + $0x4] ss:$16 sps:$4 sm:$0x1f]  }
 0x204   :  { %1547 = vmatprep.subr.bf16.mxu1 %v4137_v3  ;;  %v2211_v3 = vld [vmem:[%s5019_s3] sm:$0xff] }
 0x207   :  { %1548 = vmatpush1.bf16.msra.mxu1 %v4135_v4  ;;  %v4203_v4 = vld [vmem:[%s5024_s8] ss:$16 sps:$4 sm:$0x1f]  }
 0x208   :  { %1549 = vmatprep.subr.bf16.mxu1 %v4140_v5  ;;  %v4204_v5 = vld [vmem:[%s5024_s8 + $0xc] ss:$16 sps:$4 sm:$0x1f]  }
 0x29d   :  { %v3785_v6 = vpop.f32.mrb[4].mxu0 }
 0x29e   :  { %v3786_v8 = vpop.f32.mrb[5].mxu0 }
 0x29f   :  { %v3787_v9 = vadd.f32 %v3786_v8, %v3785_v6  ;;  %v3788_v10 = vpop.f32.mrb[6].mxu0  ;;  %v4138_v6 = vld [vmem:[#allocation3 + $0x388] ss:$16 sps:$4 sm:$0xff]  }
 0x2a0   :  { %v3789_v11 = vpop.f32.mrb[7].mxu0  ;;  %1550 = vmatpush1.bf16.msra.mxu1 %v4138_v6  ;;  %v4141_v8 = vld [vmem:[#allocation3 + $0x3a8] ss:$16 sps:$4 sm:$0xff]  }
 0x2a1   :  { %v4798_v13 = vadd.f32 %v3787_v9, %v3596_v7  ;;  %v3790_v14 = vadd.f32 %v3789_v11, %v3788_v10  ;;  %v4146_v9 = vld [vmem:[#allocation3 + $0x3cc] ss:$16 sps:$4 sm:$0xff]   ;;  %v4144_v10 = vld [vmem:[#allocation3 + $0x3c8] ss:$16 sps:$4 sm:$0xff]  }
 0x2a2   :  { %v4149_v11 = vld [vmem:[#allocation3 + $0x3ec] ss:$16 sps:$4 sm:$0xff]  }
 0x2a3   :  { %v4803_v17 = vadd.f32 %v3790_v14, %v3596_v7  ;;  %v1838_v18 = vadd.f32 %v1836_v12, %v4798_v13  ;;  %v4143_v7 = vld [vmem:[#allocation3 + $0x3ac] ss:$16 sps:$4 sm:$0xff]   ;;  %v4147_v12 = vld [vmem:[#allocation3 + $0x3e8] ss:$16 sps:$4 sm:$0xff]  }
 0x2a4   :  { %1551 = vmatprep.subr.bf16.mxu1 %v4143_v7  ;;  %v4152_v14 = vld [vmem:[#allocation3 + $0x40c] ss:$16 sps:$4 sm:$0xff]  }
 0x2a5   :  { %v1839_v25 = vadd.f32 %v1837_v15, %v4803_v17  ;;  %v4807_v26 = vmul.f32 %v1840_v16, %v1838_v18  ;;  %1552 = vmatpush1.bf16.msra.mxu1 %v4141_v8  ;;  %v4150_v15 = vld [vmem:[#allocation3 + $0x408] ss:$16 sps:$4 sm:$0xff]  }
 0x2a6   :  { %1553 = vmatprep.subr.bf16.mxu1 %v4146_v9  ;;  %v4153_v18 = vld [vmem:[#allocation3 + $0x428] ss:$16 sps:$4 sm:$0xff]  }
 0x2a7   :  { %v4809_v27 = vmul.f32 %v1840_v16, %v1839_v25  ;;  %v1844_v28 = vsel %vm1843_vm1, %v4807_v26, -inf  ;;  %v4155_v16 = vld [vmem:[#allocation3 + $0x42c] ss:$16 sps:$4 sm:$0xff]  }
 0x2a8   :  { %1845 = vmax.xlane.f32.xlu0 %v1844_v28  ;;  %v4158_v25 = vld [vmem:[#allocation3 + $0x44c] ss:$16 sps:$4 sm:$0xff]   ;;  %v4156_v28 = vld [vmem:[#allocation3 + $0x448] ss:$16 sps:$4 sm:$0xff]  }
 0x2a9   :  { %v1847_v29 = vsel %vm1843_vm1, %v4809_v27, -inf  ;;  %1554 = vmatpush1.bf16.msra.mxu1 %v4144_v10 }
 0x2aa   :  { %1555 = vmatprep.subr.bf16.mxu1 %v4149_v11 }
 0x2ac   :  { %1848 = vmax.xlane.f32.xlu0 %v1847_v29  ;;  %v4161_v29 = vld [vmem:[#allocation3 + $0x46c] ss:$16 sps:$4 sm:$0xff]  }
 0x2ad   :  { %1556 = vmatpush1.bf16.msra.mxu1 %v4147_v12 }
 0x2ae   :  { %1568 = vmatprep.subr.bf16.mxu1 %v4152_v14 }
 0x2b0   :  { %1558 = vmatmul.mubr.bf16.vlgmr.msra.gmra.mrb[4].mxu1 %v4709_v21  ;;  %v4165_v21 = vld [vmem:[#allocation3 + $0x4a8] ss:$16 sps:$4 sm:$0xff]  }
 0x2b1   :  { %1569 = vmatpush1.bf16.msra.mxu1 %v4150_v15  ;;  %1600 = vmatprep.mubr.bf16.mxu1 %v4711_v23  ;;  %v4168_v23 = vld [vmem:[#allocation3 + $0x4c8] ss:$16 sps:$4 sm:$0xff]   ;;  %v4207_v15 = vld [vmem:[%s5025_s9 + $0x40] sm:$0xff]  }
 0x2b2   :  { %1570 = vmatprep.subr.bf16.mxu1 %v4155_v16  ;;  %v4208_v16 = vld [vmem:[%s5025_s9] sm:$0xff]  }
 0x2b5   :  { %1571 = vmatpush1.bf16.msra.mxu1 %v4153_v18  ;;  %v4209_v18 = vld [vmem:[%s5025_s9 + $0x48] sm:$0xff]  }
 0x2b6   :  { %1572 = vmatprep.subr.bf16.mxu1 %v4158_v25  ;;  %v4210_v25 = vld [vmem:[%s5025_s9 + $0x8] sm:$0xff]  }
 0x2b9   :  { %1573 = vmatpush1.bf16.msra.mxu1 %v4156_v28  ;;  %v4211_v28 = vld [vmem:[%s5025_s9 + $0x50] sm:$0xff]  }
 0x2ba   :  { %1574 = vmatprep.subr.bf16.mxu1 %v4161_v29  ;;  %v4212_v29 = vld [vmem:[%s5025_s9 + $0x10] sm:$0xff]  }
 0x2bd   :  { %1575 = vmatpush1.bf16.msra.mxu1 %v4159_v30  ;;  %v4213_v30 = vld [vmem:[%s5025_s9 + $0x58] sm:$0xff]  }
 0x2be   :  { %1576 = vmatprep.subr.bf16.mxu1 %v4164_v31  ;;  %v4214_v31 = vld [vmem:[%s5025_s9 + $0x18] sm:$0xff]  }
 0x2c1   :  { %1577 = vmatpush1.bf16.msra.mxu1 %v4162_v32  ;;  %v4215_v32 = vld [vmem:[%s5025_s9 + $0x60] sm:$0xff]  }
 0x2c2   :  { %1578 = vmatprep.subr.bf16.mxu1 %v4167_v33  ;;  %2215 = vrot.lane.b32.xlu0 %v2211_v3, %s4542_s20  ;;  %v4216_v33 = vld [vmem:[%s5025_s9 + $0x20] sm:$0xff]  }
 0x2c5   :  { %1579 = vmatpush1.bf16.msra.mxu1 %v4165_v21  ;;  %v4217_v21 = vld [vmem:[%s5025_s9 + $0x68] sm:$0xff]  }
 0x2c6   :  { %1580 = vmatprep.subr.bf16.mxu1 %v4170_v34  ;;  %v4218_v34 = vld [vmem:[%s5025_s9 + $0x28] sm:$0xff]  }
 0x2c9   :  { %1581 = vmatpush1.bf16.msra.mxu1 %v4168_v23  ;;  %v4219_v23 = vld [vmem:[%s5025_s9 + $0x70] sm:$0xff]  }
 0x2ca   :  { %1582 = vmatprep.subr.bf16.mxu1 %v4173_v35  ;;  %v4220_v35 = vld [vmem:[%s5025_s9 + $0x30] sm:$0xff]  }
 0x2cd   :  { %1583 = vmatpush1.bf16.msra.mxu1 %v4171_v36  ;;  %v4221_v36 = vld [vmem:[%s5025_s9 + $0x78] sm:$0xff]  }
 0x2ce   :  { %1584 = vmatprep.subr.bf16.mxu1 %v4176_v37  ;;  %v4222_v37 = vld [vmem:[%s5025_s9 + $0x38] sm:$0xff]  }
 0x2d1   :  { %1585 = vmatpush1.bf16.msra.mxu1 %v4174_v38  ;;  %v2212_v38 = vld [vmem:[%s5019_s3 + $0x8] sm:$0xff] }
 0x2d2   :  { %1586 = vmatprep.subr.bf16.mxu1 %v4179_v39  ;;  %v316_v39 = vsub.s32 2, %v4775_v19 }
 0x2d5   :  { %1587 = vmatpush1.bf16.msra.mxu1 %v4177_v41  ;;  %v320_v41 = vsub.s32 3, %v4775_v19 }
 0x2d6   :  { %1588 = vmatprep.subr.bf16.mxu1 %v4182_v43  ;;  %v317_v43 = vrot.slane %v4783_v22, %v316_v39 }
 0x2d9   :  { %1589 = vmatpush1.bf16.msra.mxu1 %v4180_v45  ;;  %v321_v45 = vrot.slane %v4783_v22, %v320_v41  ;;  %v4223_v22 = vld [vmem:[%s5027_s11] ss:$8 sps:$4 sm:$0xff]  }
 0x2da   :  { %1590 = vmatprep.subr.bf16.mxu1 %v4185_v47 }
 0x2dd   :  { %1591 = vmatpush1.bf16.msra.mxu1 %v4183_v50 }
 0x2de   :  { %1592 = vmatprep.subr.bf16.mxu1 %v4188_v53 }
 0x2e1   :  { %1593 = vmatpush1.bf16.msra.mxu1 %v4186_v56 }
 0x2e2   :  { %1594 = vmatprep.subr.bf16.mxu1 %v4191_v40 }
 0x2e5   :  { %1595 = vmatpush1.bf16.msra.mxu1 %v4189_v57 }
 0x2e6   :  { %1596 = vmatprep.subr.bf16.mxu1 %v4194_v42 }
 0x2e9   :  { %1597 = vmatpush1.bf16.msra.mxu1 %v4192_v58  ;;  %v4225_v58 = vld [vmem:[%s5027_s11 + $0x4] ss:$8 sps:$4 sm:$0xff]  }
 0x2ea   :  { %1598 = vmatprep.subr.bf16.mxu1 %v4197_v61  ;;  %v3621_v61 = vld [vmem:[%s5026_s10] ss:$0 sm:$0xff] }
 0x335   :  { %v1846_v46 = vpop.xlane.xlu0 %1845 }
 0x336   :  { %v1850_v48 = vsub.f32 %v4807_v26, %v1846_v46 }
 0x338   :  { %v1852_v49 = vmul.f32 1.442695, %v1850_v48 }
 0x339   :  { %v1849_v52 = vpop.xlane.xlu0 %1848 }
 0x33a   :  { %4391 = vpow2.f32 %v1852_v49  ;;  %v1851_v54 = vsub.f32 %v4809_v27, %v1849_v52  ;;  %v4195_v27 = vld [vmem:[#allocation3 + $0x5e8] ss:$16 sps:$4 sm:$0xff]  }
 0x33b   :  { %1599 = vmatpush1.bf16.msra.mxu1 %v4195_v27 }
 0x33c   :  { %v1854_v55 = vmul.f32 1.442695, %v1851_v54  ;;  %1611 = vmatprep.subr.bf16.mxu1 %v4200_v0 }
 0x33e   :  { %4393 = vpow2.f32 %v1854_v55  ;;  %1601 = vmatmul.mubr.bf16.vlgmr.msra.gmra.mrb[4].mxu1 %v4724_v60  ;;  %v1892_v60 = vsel %vm1890_vm2, %v4203_v4, 0 }
 0x33f   :  { %1612 = vmatpush1.bf16.msra.mxu1 %v4198_v1  ;;  %1643 = vmatprep.mubr.bf16.mxu1 %v4541_v44 }
 0x340   :  { %3617 = vmatprep.subr.msk.bf16.mxu1 %vm1890_vm2, %v4201_v2 }
 0x344   :  { %v4392_v26 = vpop.eup %4391 }
 0x345   :  { %v1856_v59 = vsel %vm1843_vm1, %v4392_v26, 0.0 }
 0x346   :  { %1857 = vadd.xlane.f32.xlu1 %v1856_v59 }
 0x348   :  { %v4394_v62 = vpop.eup %4393 }
 0x349   :  { %v1859_v63 = vsel %vm1843_vm1, %v4394_v62, 0.0 }
 0x34a   :  { %1860 = vadd.xlane.f32.xlu1 %v1859_v63  ;;  %3595 = vmatmul.mubr.msk.bf16.vlgmr.msra.gmra.mrb[4].mxu1 %vm1306_vm0, %v4692_v51  ;;  %v4206_v51 = vld [vmem:[%s5024_s8 + $0x8] ss:$16 sps:$4 sm:$0x1f]  }
 0x34b   :  { %1904 = vmatpush1.bf16.msra.mxu1 %v1892_v60  ;;  %1935 = vmatprep.mubr.bf16.mxu1 %v4541_v44  ;;  %v1898_v14 = vsel %vm1890_vm2, %v4206_v51, 0 }
 0x34c   :  { %3619 = vmatprep.subr.msk.bf16.mxu1 %vm1890_vm2, %v4204_v5 }
 0x35b   :  { %2217 = vrot.lane.b32.xlu1 %v2212_v38, %s4542_s20 }
 0x3d3   :  { %v1858_v6 = vpop.xlane.xlu1 %1857 }
 0x3d4   :  { %4395 = vrcp.f32 %v1858_v6 }
 0x3d7   :  { %v1861_v7 = vpop.xlane.xlu1 %1860 }
 0x3d8   :  { %4397 = vrcp.f32 %v1861_v7 }
 0x3de   :  { %v4396_v8 = vpop.eup %4395 }
 0x3df   :  { %v1864_v9 = vmul.f32 %v4396_v8, %v4392_v26 }
 0x3e1   :  { %3346 = vrot.lane.b32.xlu0 %v1864_v9, %s4543_s24 }
 0x3e2   :  { %v4398_v10 = vpop.eup %4397 }
 0x3e3   :  { %v4848_v11 = vmul.f32 %v4398_v10, %v4394_v62 }
 0x3e5   :  { %v1866_v12 = vpack.c.bf16 %v4848_v11, %v1864_v9 }
 0x3e7   :  { %3618 = vmatmul.mubr.msk.bf16.vlgmr.msra.gmra.mrb[4].mxu1 %vm1843_vm1, %v1866_v12 }
 0x3e8   :  { %1947 = vmatpush1.bf16.msra.mxu1 %v1898_v14  ;;  %1978 = vmatprep.mubr.bf16.mxu1 %v4541_v44 }
 0x3e9   :  { %3791 = vmatprep.subr.bf16.mxu1 %v4207_v15 }
 0x3ef   :  { %3620 = vmatmul.mubr.msk.bf16.vlgmr.msra.gmra.mrb[8].mxu1 %vm1843_vm1, %v1866_v12 }
 0x3f0   :  { %3792 = vmatpush3.bf16.msra.mxu1 %v4208_v16 }
 0x3f1   :  { %3793 = vmatprep.subr.bf16.mxu1 %v4209_v18  ;;  %v4226_v18 = vld [vmem:[%s5027_s11 + $0x10] ss:$8 sps:$4 sm:$0xff]  }
 0x3f4   :  { %3794 = vmatpush3.bf16.msra.mxu1 %v4210_v25  ;;  %v4228_v25 = vld [vmem:[%s5027_s11 + $0x14] ss:$8 sps:$4 sm:$0xff]   ;;  %s4544_s11 = smov 64  }
 0x3f5   :  { %3795 = vmatprep.subr.bf16.mxu1 %v4211_v28 }
 0x3f8   :  { %3796 = vmatpush3.bf16.msra.mxu1 %v4212_v29 }
 0x3f9   :  { %3797 = vmatprep.subr.bf16.mxu1 %v4213_v30 }
 0x3fc   :  { %3798 = vmatpush3.bf16.msra.mxu1 %v4214_v31 }
 0x3fd   :  { %3799 = vmatprep.subr.bf16.mxu1 %v4215_v32 }
 0x400   :  { %3800 = vmatpush3.bf16.msra.mxu1 %v4216_v33 }
 0x401   :  { %3801 = vmatprep.subr.bf16.mxu1 %v4217_v21 }
 0x404   :  { %3802 = vmatpush3.bf16.msra.mxu1 %v4218_v34 }
 0x405   :  { %3803 = vmatprep.subr.bf16.mxu1 %v4219_v23 }
 0x408   :  { %3804 = vmatpush3.bf16.msra.mxu1 %v4220_v35 }
 0x409   :  { %3805 = vmatprep.subr.bf16.mxu1 %v4221_v36 }
 0x40c   :  { %3806 = vmatpush3.bf16.msra.mxu1 %v4222_v37 }
 0x40d   :  { %2262 = vmatprep.subr.bf16.mxu1 %v4225_v58  ;;  %v4232_v58 = vld [vmem:[#allocation6 + $0x8] ss:$28 sps:$4 sm:$0xff]  }
 0x4ba   :  { %v1937_v46 = vpop.f32.mrb[4].mxu1 }
 0x4bb   :  { %v3843_v47 = vadd.f32 %v1937_v46, %v317_v43  ;;  %v1939_v48 = vpop.f32.mrb[5].mxu1 }
 0x4bc   :  { %v3844_v49 = vadd.f32 %v1939_v48, %v321_v45  ;;  %v1941_v50 = vpop.f32.mrb[6].mxu1 }
 0x4bd   :  { %v3845_v52 = vadd.f32 %v1941_v50, %v317_v43  ;;  %v1943_v53 = vpop.f32.mrb[7].mxu1  ;;  %v1993_v55 = vmax.f32 %v3843_v47, 0.0  ;;  %v2216_v43 = vpop.permute.xlu0 %2215 }
 0x4be   :  { %v3846_v54 = vadd.f32 %v1943_v53, %v321_v45  ;;  %v1994_v40 = vmax.f32 %v3844_v49, 0.0  ;;  %v2218_v49 = vpop.permute.xlu1 %2217  ;;  %v4229_v53 = vld [vmem:[#allocation6] ss:$28 sps:$4 sm:$0xff]  }
 0x4bf   :  { %v1995_v56 = vmax.f32 %v3845_v52, 0.0 }
 0x4c0   :  { %v1996_v57 = vmax.f32 %v3846_v54, 0.0  ;;  %v4231_v54 = vld [vmem:[#allocation6 + $0x4] ss:$28 sps:$4 sm:$0xff]  }
 0x4c1   :  { %v1997_v42 = vpack.c.bf16 %v1995_v56, %v1993_v55  ;;  %v4234_v56 = vld [vmem:[#allocation6 + $0xc] ss:$28 sps:$4 sm:$0xff]   ;;  %3068 = vmatprep.subr.bf16.mxu0 %v4231_v54  ;;  %v4307_v54 = vld [vmem:[#allocation6 + $0x2d8] ss:$28 sps:$4 sm:$0xff]  }
 0x4c2   :  { %v1998_v26 = vpack.c.bf16 %v1996_v57, %v1994_v40  ;;  %v4237_v40 = vld [vmem:[#allocation6 + $0x3c] ss:$28 sps:$4 sm:$0xff]   ;;  %3069 = vmatpush1.bf16.msra.mxu0 %v4229_v53  ;;  %v4306_v53 = vld [vmem:[#allocation6 + $0x2ac] ss:$28 sps:$4 sm:$0xff]  }
 0x4c3   :  { %3070 = vmatprep.subr.bf16.mxu0 %v4237_v40  ;;  %v4310_v40 = vld [vmem:[#allocation6 + $0x2e0] ss:$28 sps:$4 sm:$0xff]  }
 0x4c4   :  { %2166 = vmatprep.mubr.bf16.mxu1 %v1998_v26 }
 0x4c5   :  { %2167 = vmatmul.mubr.bf16.vlgmr.msra.gmra.mrb[12].mxu1 %v1997_v42  ;;  %v4235_v42 = vld [vmem:[#allocation6 + $0x38] ss:$28 sps:$4 sm:$0xff]  }
 0x4c6   :  { %2294 = vmatprep.mubr.bf16.mxu1 %v4541_v44  ;;  %2263 = vmatpush1.bf16.msra.mxu1 %v4223_v22  ;;  %v4243_v22 = vld [vmem:[#allocation6 + $0x74] ss:$28 sps:$4 sm:$0xff]  }
 0x4c7   :  { %2264 = vmatprep.subr.bf16.mxu1 %v4228_v25  ;;  %3071 = vmatpush1.bf16.msra.mxu0 %v4235_v42  ;;  %v4276_v25 = vld [vmem:[#allocation6 + $0x194] ss:$28 sps:$4 sm:$0xff]   ;;  %v4318_v42 = vld [vmem:[#allocation6 + $0x31c] ss:$28 sps:$4 sm:$0xff]  }
 0x4c8   :  { %3072 = vmatprep.subr.bf16.mxu0 %v4243_v22  ;;  %v4316_v22 = vld [vmem:[#allocation6 + $0x318] ss:$28 sps:$4 sm:$0xff]  }
 0x4ca   :  { %2265 = vmatpush1.bf16.msra.mxu1 %v4226_v18  ;;  %v4268_v18 = vld [vmem:[#allocation6 + $0x158] ss:$28 sps:$4 sm:$0xff]  }
 0x4cb   :  { %3111 = vmatprep.subr.bf16.mxu1 %v4234_v56  ;;  %v4312_v56 = vld [vmem:[#allocation6 + $0x2e4] ss:$28 sps:$4 sm:$0xff]  }
 0x598   :  { %v3807_v59 = vpop.f32.mrb[12].mxu1 }
 0x599   :  { %v3808_v62 = vpop.f32.mrb[13].mxu1 }
 0x59a   :  { %v3809_v27 = vadd.f32 %v3808_v62, %v3807_v59  ;;  %v3810_v63 = vpop.f32.mrb[14].mxu1  ;;  %v4240_v59 = vld [vmem:[#allocation6 + $0x44] ss:$28 sps:$4 sm:$0xff]   ;;  %v4249_v62 = vld [vmem:[#allocation6 + $0xac] ss:$28 sps:$4 sm:$0xff]  }
 0x59b   :  { %v3811_v0 = vpop.f32.mrb[15].mxu1 }
 0x59c   :  { %v4925_v44 = vadd.f32 %v3809_v27, %v3621_v61  ;;  %v3812_v1 = vadd.f32 %v3811_v0, %v3810_v63  ;;  %v4238_v27 = vld [vmem:[#allocation6 + $0x40] ss:$28 sps:$4 sm:$0xff]   ;;  %v4247_v0 = vld [vmem:[#allocation6 + $0xa8] ss:$28 sps:$4 sm:$0xff]  }
 0x59d   :  { %v4246_v63 = vld [vmem:[#allocation6 + $0x7c] ss:$28 sps:$4 sm:$0xff]  }
 0x59e   :  { %v2181_v2 = vand.u32 2147483647, %v4925_v44  ;;  %v4928_v3 = vadd.f32 %v3812_v1, %v3621_v61  ;;  %v2175_v21 = vmax.f32 %v4925_v44, 0.0  ;;  %vm2177_vm5 = vcmp.ne.f32.partialorder %v4925_v44, %v4925_v44  ;;  %v4241_v61 = vld [vmem:[#allocation6 + $0x70] ss:$28 sps:$4 sm:$0xff]  }
 0x59f   :  { %3073 = vmatpush1.bf16.msra.mxu0 %v4241_v61  ;;  %v4255_v1 = vld [vmem:[#allocation6 + $0xe4] ss:$28 sps:$4 sm:$0xff]   ;;  %v4322_v61 = vld [vmem:[#allocation6 + $0x350] ss:$28 sps:$4 sm:$0xff]  }
 0x5a0   :  { %v2183_v4 = vsub.f32 0.0, %v2181_v2  ;;  %v2182_v60 = vand.u32 2147483647, %v4928_v3  ;;  %v2176_v36 = vmax.f32 %v4928_v3, 0.0  ;;  %vm2178_vm6 = vcmp.ne.f32.partialorder %v4928_v3, %v4928_v3  ;;  %3074 = vmatprep.subr.bf16.mxu0 %v4249_v62  ;;  %v4252_v2 = vld [vmem:[#allocation6 + $0xb4] ss:$28 sps:$4 sm:$0xff]  }
 0x5a1   :  { %v4327_v62 = vld [vmem:[#allocation6 + $0x14] ss:$28 sps:$4 sm:$0xff]  }
 0x5a2   :  { %v2185_v5 = vmul.f32 1.442695, %v2183_v4  ;;  %v2184_v6 = vsub.f32 0.0, %v2182_v60  ;;  %v4253_v4 = vld [vmem:[#allocation6 + $0xe0] ss:$28 sps:$4 sm:$0xff]  }
 0x5a3   :  { %3075 = vmatpush1.bf16.msra.mxu0 %v4247_v0  ;;  %v4261_v60 = vld [vmem:[#allocation6 + $0x11c] ss:$28 sps:$4 sm:$0xff]  }
 0x5a4   :  { %4399 = vpow2.f32 %v2185_v5  ;;  %v2187_v7 = vmul.f32 1.442695, %v2184_v6  ;;  %3076 = vmatprep.subr.bf16.mxu0 %v4255_v1  ;;  %v4250_v5 = vld [vmem:[#allocation6 + $0xb0] ss:$28 sps:$4 sm:$0xff]  }
 0x5a5   :  { %v4258_v6 = vld [vmem:[#allocation6 + $0xec] ss:$28 sps:$4 sm:$0xff]  }
 0x5a6   :  { %4401 = vpow2.f32 %v2187_v7  ;;  %v4267_v7 = vld [vmem:[#allocation6 + $0x154] ss:$28 sps:$4 sm:$0xff]  }
 0x5a7   :  { %3077 = vmatpush1.bf16.msra.mxu0 %v4253_v4 }
 0x5a8   :  { %3078 = vmatprep.subr.bf16.mxu0 %v4261_v60 }
 0x5ae   :  { %v4400_v8 = vpop.eup %4399 }
 0x5af   :  { %v2189_v9 = vadd.f32 1.0, %v4400_v8  ;;  %v2192_v12 = vmul.f32 -0.5, %v4400_v8  ;;  %v2195_v16 = vand.u32 2147483647, %v4400_v8 }
 0x5b0   :  { %v4402_v51 = vpop.eup %4401 }
 0x5b1   :  { %v2198_v10 = vadd.f32 1.0, %v4402_v51  ;;  %4403 = vlog2.f32 %v2189_v9  ;;  %v2201_v14 = vmul.f32 -0.5, %v4402_v51  ;;  %v2193_v15 = vadd.f32 1.0, %v2192_v12  ;;  %v4264_v9 = vld [vmem:[#allocation6 + $0x124] ss:$28 sps:$4 sm:$0xff]  }
 0x5b2   :  { %v2204_v30 = vand.u32 2147483647, %v4402_v51  ;;  %vm2196_vm3 = vcmp.lt.f32.partialorder %v2195_v16, 0.0004427343  ;;  %v4262_v12 = vld [vmem:[#allocation6 + $0x120] ss:$28 sps:$4 sm:$0xff]  }
 0x5b3   :  { %4405 = vlog2.f32 %v2198_v10  ;;  %v2202_v28 = vadd.f32 1.0, %v2201_v14  ;;  %v2194_v32 = vmul.f32 %v4400_v8, %v2193_v15  ;;  %v4256_v8 = vld [vmem:[#allocation6 + $0xe8] ss:$28 sps:$4 sm:$0xff]   ;;  %v4270_v14 = vld [vmem:[#allocation6 + $0x15c] ss:$28 sps:$4 sm:$0xff]  }
 0x5b4   :  { %vm2205_vm4 = vcmp.lt.f32.partialorder %v2204_v30, 0.0004427343  ;;  %v4273_v10 = vld [vmem:[#allocation6 + $0x18c] ss:$28 sps:$4 sm:$0xff]   ;;  %v4279_v16 = vld [vmem:[#allocation6 + $0x1c4] ss:$28 sps:$4 sm:$0xff]  }
 0x5b5   :  { %v2203_v23 = vmul.f32 %v4402_v51, %v2202_v28  ;;  %v4265_v51 = vld [vmem:[#allocation6 + $0x150] ss:$28 sps:$4 sm:$0xff]   ;;  %v4271_v15 = vld [vmem:[#allocation6 + $0x188] ss:$28 sps:$4 sm:$0xff]   ;;  %v4277_v28 = vld [vmem:[#allocation6 + $0x1c0] ss:$28 sps:$4 sm:$0xff]  }
 0x5b6   :  { %v4274_v30 = vld [vmem:[#allocation6 + $0x190] ss:$28 sps:$4 sm:$0xff]  }
 0x5bb   :  { %v4404_v29 = vpop.eup %4403 }
 0x5bc   :  { %v2191_v31 = vmul.f32 0.6931472, %v4404_v29  ;;  %v4285_v29 = vld [vmem:[#allocation6 + $0x1fc] ss:$28 sps:$4 sm:$0xff]  }
 0x5bd   :  { %v4406_v33 = vpop.eup %4405 }
 0x5be   :  { %v2200_v34 = vmul.f32 0.6931472, %v4406_v33  ;;  %v2197_v35 = vsel %vm2196_vm3, %v2194_v32, %v2191_v31  ;;  %v4282_v31 = vld [vmem:[#allocation6 + $0x1cc] ss:$28 sps:$4 sm:$0xff]   ;;  %v4283_v32 = vld [vmem:[#allocation6 + $0x1f8] ss:$28 sps:$4 sm:$0xff]  }
 0x5bf   :  { %v2207_v37 = vadd.f32 %v2197_v35, %v2175_v21  ;;  %v4291_v33 = vld [vmem:[#allocation6 + $0x234] ss:$28 sps:$4 sm:$0xff]   ;;  %v4280_v21 = vld [vmem:[#allocation6 + $0x1c8] ss:$28 sps:$4 sm:$0xff]  }
 0x5c0   :  { %v2206_v38 = vsel %vm2205_vm4, %v2203_v23, %v2200_v34  ;;  %v4288_v34 = vld [vmem:[#allocation6 + $0x204] ss:$28 sps:$4 sm:$0xff]   ;;  %v4289_v23 = vld [vmem:[#allocation6 + $0x230] ss:$28 sps:$4 sm:$0xff]  }
 0x5c1   :  { %v2208_v45 = vadd.f32 %v2206_v38, %v2176_v36  ;;  %v4942_v46 = vsel %vm2177_vm5, %v4925_v44, %v2207_v37  ;;  %v4297_v35 = vld [vmem:[#allocation6 + $0x26c] ss:$28 sps:$4 sm:$0xff]   ;;  %v4286_v36 = vld [vmem:[#allocation6 + $0x200] ss:$28 sps:$4 sm:$0xff]  }
 0x5c2   :  { %v2221_v47 = vmul.f32 %v2216_v43, %v4942_v46  ;;  %v4294_v37 = vld [vmem:[#allocation6 + $0x23c] ss:$28 sps:$4 sm:$0xff]   ;;  %v4295_v38 = vld [vmem:[#allocation6 + $0x268] ss:$28 sps:$4 sm:$0xff]   ;;  %v3360_v1 = vsel %vm2258_vm7, %v4925_v44, %v4942_v46 }
 0x5c3   :  { %v4948_v48 = vsel %vm2178_vm6, %v4928_v3, %v2208_v45  ;;  %v4303_v43 = vld [vmem:[#allocation6 + $0x2a4] ss:$28 sps:$4 sm:$0xff]   ;;  %v4292_v45 = vld [vmem:[#allocation6 + $0x238] ss:$28 sps:$4 sm:$0xff]  }
 0x5c4   :  { %2225 = vrot.lane.b32.xlu1 %v2221_v47, %s4543_s24  ;;  %v2222_v50 = vmul.f32 %v2218_v49, %v4948_v48  ;;  %v4300_v47 = vld [vmem:[#allocation6 + $0x274] ss:$28 sps:$4 sm:$0xff]   ;;  %v4301_v49 = vld [vmem:[#allocation6 + $0x2a0] ss:$28 sps:$4 sm:$0xff]   ;;  %v3361_v4 = vsel %vm2258_vm7, %v4928_v3, %v4948_v48 }
 0x5c8   :  { %2227 = vrot.lane.b32.xlu1 %v2222_v50, %s4543_s24  ;;  %v4309_v50 = vld [vmem:[#allocation6 + $0x2dc] ss:$28 sps:$4 sm:$0xff]  }
 0x5cc   :  { %3348 = vrot.lane.b32.xlu1 %v4848_v11, %s4543_s24  ;;  %s4545_s24 = smov 106  }
 0x636   :  { %v2226_v52 = vpop.permute.xlu1 %2225 }
 0x637   :  { %v2231_v55 = vadd.f32 %v2226_v52, %v4925_v44  ;;  %v4298_v52 = vld [vmem:[#allocation6 + $0x270] ss:$28 sps:$4 sm:$0xff]  }
 0x639   :  { %3338 = vrot.lane.b32.xlu0 %v2231_v55, %s4544_s11 }
 0x63a   :  { %v2228_v57 = vpop.permute.xlu1 %2227 }
 0x63b   :  { %v2232_v26 = vadd.f32 %v2228_v57, %v4928_v3  ;;  %v4315_v57 = vld [vmem:[#allocation6 + $0x314] ss:$28 sps:$4 sm:$0xff]   ;;  %v2305_v3 = vld [vmem:[%s5028_s12] sm:$0x3] }
 0x63c   :  { %v2310_v48 = vrot.slane %v2305_v3, %v4778_v20 }
 0x63d   :  { %v2233_v11 = vpack.c.bf16 %v2232_v26, %v2231_v55  ;;  %3354 = vrot.lane.b32.xlu0 %v4798_v13, %s4545_s24  ;;  %3340 = vrot.lane.b32.xlu1 %v2232_v26, %s4544_s11  ;;  %v4244_v13 = vld [vmem:[#allocation6 + $0x78] ss:$28 sps:$4 sm:$0xff]   ;;  %v4304_v55 = vld [vmem:[#allocation6 + $0x2a8] ss:$28 sps:$4 sm:$0xff]   ;;  %v4313_v26 = vld [vmem:[#allocation6 + $0x310] ss:$28 sps:$4 sm:$0xff]  }
 0x63e   :  { %v3349_v0 = vpop.permute.xlu1 %3348 }
 0x63f   :  { %3642 = vmatmul.mubr.msk.bf16.vlgmr.msra.gmra.mrb[8].mxu1 %vm2258_vm7, %v2233_v11  ;;  %v4324_v11 = vld [vmem:[#allocation6 + $0x354] ss:$28 sps:$4 sm:$0xff]  }
 0x640   :  { %3112 = vmatpush1.bf16.msra.mxu1 %v4232_v58  ;;  %v4321_v58 = vld [vmem:[#allocation6 + $0x34c] ss:$28 sps:$4 sm:$0xff]  }
 0x641   :  { %3356 = vrot.lane.b32.xlu1 %v4803_v17, %s4545_s24  ;;  %3113 = vmatprep.subr.bf16.mxu1 %v4240_v59  ;;  %v4259_v17 = vld [vmem:[#allocation6 + $0x118] ss:$28 sps:$4 sm:$0xff]   ;;  %v4319_v59 = vld [vmem:[#allocation6 + $0x348] ss:$28 sps:$4 sm:$0xff]  }
 0x642   :  { %3079 = vmatpush1.bf16.msra.mxu0 %v4259_v17 }
 0x643   :  { %3080 = vmatprep.subr.bf16.mxu0 %v4267_v7 }
 0x644   :  { %3114 = vmatpush1.bf16.msra.mxu1 %v4238_v27  ;;  %v4328_v27 = vld [vmem:[#allocation6 + $0x1d8] ss:$28 sps:$4 sm:$0xff]  }
 0x645   :  { %3115 = vmatprep.subr.bf16.mxu1 %v4246_v63  ;;  %v3347_v63 = vpop.permute.xlu0 %3346 }
 0x646   :  { %3081 = vmatpush1.bf16.msra.mxu0 %v4265_v51 }
 0x647   :  { %3082 = vmatprep.subr.bf16.mxu0 %v4273_v10  ;;  %v2314_v10 = vrot.slane %v2305_v3, %v4786_v24  ;;  %v4385_v3 = vld [vmem:[#allocation6 + $0x324] ss:$28 sps:$4 sm:$0xff]  }
 0x648   :  { %3116 = vmatpush1.bf16.msra.mxu1 %v4244_v13 }
 0x649   :  { %3117 = vmatprep.subr.bf16.mxu1 %v4252_v2 }
 0x64a   :  { %3083 = vmatpush1.bf16.msra.mxu0 %v4271_v15 }
 0x64b   :  { %3084 = vmatprep.subr.bf16.mxu0 %v4279_v16 }
 0x64c   :  { %3118 = vmatpush1.bf16.msra.mxu1 %v4250_v5 }
 0x64d   :  { %3119 = vmatprep.subr.bf16.mxu1 %v4258_v6 }
 0x64e   :  { %3085 = vmatpush1.bf16.msra.mxu0 %v4277_v28 }
 0x64f   :  { %3086 = vmatprep.subr.bf16.mxu0 %v4285_v29 }
 0x650   :  { %3120 = vmatpush1.bf16.msra.mxu1 %v4256_v8 }
 0x651   :  { %3121 = vmatprep.subr.bf16.mxu1 %v4264_v9 }
 0x652   :  { %3087 = vmatpush1.bf16.msra.mxu0 %v4283_v32 }
 0x653   :  { %3088 = vmatprep.subr.bf16.mxu0 %v4291_v33 }
 0x654   :  { %3122 = vmatpush1.bf16.msra.mxu1 %v4262_v12 }
 0x655   :  { %3123 = vmatprep.subr.bf16.mxu1 %v4270_v14 }
 0x656   :  { %3089 = vmatpush1.bf16.msra.mxu0 %v4289_v23  ;;  %v4325_v23 = vld [vmem:[#allocation6 + $0x10] ss:$28 sps:$4 sm:$0xff]  }
 0x657   :  { %3090 = vmatprep.subr.bf16.mxu0 %v4297_v35  ;;  %v4329_v35 = vld [vmem:[#allocation6 + $0x18] ss:$28 sps:$4 sm:$0xff]  }
 0x658   :  { %3124 = vmatpush1.bf16.msra.mxu1 %v4268_v18 }
 0x659   :  { %3125 = vmatprep.subr.bf16.mxu1 %v4276_v25 }
 0x65a   :  { %3091 = vmatpush1.bf16.msra.mxu0 %v4295_v38  ;;  %v4330_v38 = vld [vmem:[#allocation6 + $0x48] ss:$28 sps:$4 sm:$0xff]  }
 0x65b   :  { %3092 = vmatprep.subr.bf16.mxu0 %v4303_v43  ;;  %v4334_v43 = vld [vmem:[#allocation6 + $0x50] ss:$28 sps:$4 sm:$0xff]  }
 0x65c   :  { %3126 = vmatpush1.bf16.msra.mxu1 %v4274_v30 }
 0x65d   :  { %3127 = vmatprep.subr.bf16.mxu1 %v4282_v31 }
 0x65e   :  { %3093 = vmatpush1.bf16.msra.mxu0 %v4301_v49  ;;  %v4335_v49 = vld [vmem:[#allocation6 + $0x80] ss:$28 sps:$4 sm:$0xff]  }
 0x65f   :  { %3094 = vmatprep.subr.bf16.mxu0 %v4309_v50  ;;  %v4339_v50 = vld [vmem:[#allocation6 + $0x88] ss:$28 sps:$4 sm:$0xff]  }
 0x660   :  { %3128 = vmatpush1.bf16.msra.mxu1 %v4280_v21 }
 0x661   :  { %3129 = vmatprep.subr.bf16.mxu1 %v4288_v34 }
 0x662   :  { %3095 = vmatpush1.bf16.msra.mxu0 %v4307_v54  ;;  %v4340_v54 = vld [vmem:[#allocation6 + $0xb8] ss:$28 sps:$4 sm:$0xff]  }
 0x663   :  { %3096 = vmatprep.subr.bf16.mxu0 %v4315_v57  ;;  %v4345_v57 = vld [vmem:[#allocation6 + $0xf0] ss:$28 sps:$4 sm:$0xff]  }
 0x664   :  { %3130 = vmatpush1.bf16.msra.mxu1 %v4286_v36  ;;  %v4332_v36 = vld [vmem:[#allocation6 + $0x4c] ss:$28 sps:$4 sm:$0xff]  }
 0x665   :  { %3131 = vmatprep.subr.bf16.mxu1 %v4294_v37  ;;  %v4333_v37 = vld [vmem:[#allocation6 + $0x210] ss:$28 sps:$4 sm:$0xff]  }
 0x666   :  { %3097 = vmatpush1.bf16.msra.mxu0 %v4313_v26  ;;  %v4352_v26 = vld [vmem:[#allocation6 + $0x12c] ss:$28 sps:$4 sm:$0xff]  }
 0x667   :  { %3098 = vmatprep.subr.bf16.mxu0 %v4321_v58  ;;  %v4350_v58 = vld [vmem:[#allocation6 + $0x128] ss:$28 sps:$4 sm:$0xff]  }
 0x668   :  { %3132 = vmatpush1.bf16.msra.mxu1 %v4292_v45  ;;  %v4337_v45 = vld [vmem:[#allocation6 + $0x84] ss:$28 sps:$4 sm:$0xff]  }
 0x669   :  { %3133 = vmatprep.subr.bf16.mxu1 %v4300_v47  ;;  %v4338_v47 = vld [vmem:[#allocation6 + $0x248] ss:$28 sps:$4 sm:$0xff]  }
 0x66a   :  { %3099 = vmatpush1.bf16.msra.mxu0 %v4319_v59  ;;  %v4357_v59 = vld [vmem:[#allocation6 + $0x164] ss:$28 sps:$4 sm:$0xff]  }
 0x66b   :  { %3154 = vmatprep.subr.bf16.mxu0 %v4327_v62  ;;  %v4355_v62 = vld [vmem:[#allocation6 + $0x160] ss:$28 sps:$4 sm:$0xff]  }
 0x66c   :  { %3134 = vmatpush1.bf16.msra.mxu1 %v4298_v52  ;;  %v4342_v52 = vld [vmem:[#allocation6 + $0xbc] ss:$28 sps:$4 sm:$0xff]  }
 0x66d   :  { %3135 = vmatprep.subr.bf16.mxu1 %v4306_v53  ;;  %v4343_v53 = vld [vmem:[#allocation6 + $0x280] ss:$28 sps:$4 sm:$0xff]  }
 0x670   :  { %3136 = vmatpush1.bf16.msra.mxu1 %v4304_v55  ;;  %v4344_v55 = vld [vmem:[#allocation6 + $0xc0] ss:$28 sps:$4 sm:$0xff]  }
 0x671   :  { %3137 = vmatprep.subr.bf16.mxu1 %v4312_v56  ;;  %v4347_v56 = vld [vmem:[#allocation6 + $0xf4] ss:$28 sps:$4 sm:$0xff]  }
 0x674   :  { %3138 = vmatpush1.bf16.msra.mxu1 %v4310_v40  ;;  %v4348_v40 = vld [vmem:[#allocation6 + $0x2b8] ss:$28 sps:$4 sm:$0xff]  }
 0x675   :  { %3139 = vmatprep.subr.bf16.mxu1 %v4318_v42  ;;  %v4349_v42 = vld [vmem:[#allocation6 + $0xf8] ss:$28 sps:$4 sm:$0xff]  }
 0x678   :  { %3140 = vmatpush1.bf16.msra.mxu1 %v4316_v22  ;;  %v4353_v22 = vld [vmem:[#allocation6 + $0x2f0] ss:$28 sps:$4 sm:$0xff]  }
 0x679   :  { %3141 = vmatprep.subr.bf16.mxu1 %v4324_v11  ;;  %v4354_v11 = vld [vmem:[#allocation6 + $0x130] ss:$28 sps:$4 sm:$0xff]  }
 0x67c   :  { %3142 = vmatpush1.bf16.msra.mxu1 %v4322_v61  ;;  %v4358_v61 = vld [vmem:[#allocation6 + $0x328] ss:$28 sps:$4 sm:$0xff]  }
 0x67d   :  { %3813 = vmatprep.subr.bf16.mxu1 %v4328_v27  ;;  %v4359_v27 = vld [vmem:[#allocation6 + $0x168] ss:$28 sps:$4 sm:$0xff]  }
 0x6ab   :  { %v3339_v13 = vpop.permute.xlu0 %3338 }
 0x6ac   :  { %v3363_v2 = vsel %vm3362_vm8, %v3360_v1, %v3339_v13  ;;  %v4360_v1 = vld [vmem:[#allocation6 + $0x198] ss:$28 sps:$4 sm:$0xff]   ;;  %v4364_v13 = vld [vmem:[#allocation6 + $0x1a0] ss:$28 sps:$4 sm:$0xff]  }
 0x6ad   :  { %v3366_v5 = vsel %vm3365_vm9, %v3363_v2, %v3347_v63  ;;  %v4362_v63 = vld [vmem:[#allocation6 + $0x19c] ss:$28 sps:$4 sm:$0xff]   ;;  %v4367_v2 = vld [vmem:[#allocation6 + $0x1d4] ss:$28 sps:$4 sm:$0xff]  }
 0x6af   :  { %v3341_v60 = vpop.permute.xlu1 %3340  ;;  %v3355_v6 = vpop.permute.xlu0 %3354 }
 0x6b0   :  { %v3364_v17 = vsel %vm3362_vm8, %v3361_v4, %v3341_v60  ;;  %v3369_v7 = vsel %vm3368_vm10, %v3366_v5, %v3355_v6  ;;  %v4365_v4 = vld [vmem:[#allocation6 + $0x1d0] ss:$28 sps:$4 sm:$0xff]   ;;  %v4368_v5 = vld [vmem:[#allocation6 + $0x208] ss:$28 sps:$4 sm:$0xff]  }
 0x6b1   :  { %v3372_v8 = vsel %vm3371_vm11, %v3369_v7, 0.0  ;;  %v3367_v44 = vsel %vm3365_vm9, %v3364_v17, %v3349_v0  ;;  %v4363_v0 = vld [vmem:[#allocation6 + $0x360] ss:$28 sps:$4 sm:$0xff]   ;;  %v4370_v60 = vld [vmem:[#allocation6 + $0x20c] ss:$28 sps:$4 sm:$0xff]  }
 0x6b2   :  { %3374 = vst [vmem:[%s5032_s16] sm:$0xff] %v3372_v8  ;;  %v4373_v6 = vld [vmem:[#allocation6 + $0x244] ss:$28 sps:$4 sm:$0xff]   ;;  %v4376_v7 = vld [vmem:[#allocation6 + $0x27c] ss:$28 sps:$4 sm:$0xff]  }
 0x6b3   :  { %v3357_v46 = vpop.permute.xlu1 %3356  ;;  %v4371_v17 = vld [vmem:[#allocation6 + $0x240] ss:$28 sps:$4 sm:$0xff]   ;;  %v4374_v8 = vld [vmem:[#allocation6 + $0x278] ss:$28 sps:$4 sm:$0xff]  }
 0x6b4   :  { %v3370_v9 = vsel %vm3368_vm10, %v3367_v44, %v3357_v46  ;;  %v4379_v44 = vld [vmem:[#allocation6 + $0x2b4] ss:$28 sps:$4 sm:$0xff]  }
 0x6b5   :  { %v3373_v51 = vsel %vm3371_vm11, %v3370_v9, 0.0  ;;  %v4377_v46 = vld [vmem:[#allocation6 + $0x2b0] ss:$28 sps:$4 sm:$0xff]  }
 0x6b6   :  { %3375 = vst [vmem:[%s5032_s16 + $0x8] sm:$0xff] %v3373_v51  ;;  %v4382_v9 = vld [vmem:[#allocation6 + $0x2ec] ss:$28 sps:$4 sm:$0xff]  }
 0x6b7   :  { %v4380_v51 = vld [vmem:[#allocation6 + $0x2e8] ss:$28 sps:$4 sm:$0xff]  }
 0x712   :  { %v2296_v12 = vpop.f32.mrb[8].mxu1 }
 0x713   :  { %v2317_v14 = vadd.f32 %v2310_v48, %v2296_v12  ;;  %v2298_v15 = vpop.f32.mrb[9].mxu1  ;;  %v4386_v12 = vld [vmem:[#allocation6 + $0x358] ss:$28 sps:$4 sm:$0xff]  }
 0x714   :  { %v2318_v16 = vadd.f32 %v2314_v10, %v2298_v15  ;;  %v2300_v18 = vpop.f32.mrb[10].mxu1 }
 0x715   :  { %v2319_v25 = vadd.f32 %v2310_v48, %v2300_v18  ;;  %v2302_v28 = vpop.f32.mrb[11].mxu1  ;;  %v2321_v30 = vmax.f32 %v2317_v14, 0.0  ;;  %v4383_v48 = vld [vmem:[#allocation6 + $0x320] ss:$28 sps:$4 sm:$0xff]  }
 0x716   :  { %v2320_v29 = vadd.f32 %v2314_v10, %v2302_v28  ;;  %v2322_v32 = vmax.f32 %v2318_v16, 0.0  ;;  %v4388_v10 = vld [vmem:[#allocation6 + $0x35c] ss:$28 sps:$4 sm:$0xff]   ;;  %v4986_v14 = vld [vmem:[%s5030_s14] sm:$0xff]  ;;  %s4546_s14 = smov [#allocation8]  }
 0x717   :  { %v2323_v31 = vmax.f32 %v2319_v25, 0.0  ;;  %v2460_v15 = vrot.slane %v4986_v14, %v4778_v20  ;;  %v2468_v16 = vrot.slane %v4986_v14, %v316_v39  ;;  %v2464_v18 = vrot.slane %v4986_v14, %v4786_v24  ;;  %s3381_s8 = sshll.u32 %s4546_s14, 4  ;;  %s3382_s8 = int_to_ptr.vmem [resolvable:$true] %s3381_s8 }
 0x718   :  { %v2324_v33 = vmax.f32 %v2320_v29, 0.0  ;;  %v2472_v25 = vrot.slane %v4986_v14, %v320_v41  ;;  %s4507_s6 = scalar_lea.vmem %s3382_s8, 1792  ;;  %p4512_p3 = scmp.lt.s32.totalorder %s3382_s8, %s3382_s8 }
 0x719   :  { %v4977_v21 = vpack.c.bf16 %v2323_v31, %v2321_v30  ;;  %p4508_p2 = scmp.ne.s32.totalorder %s3382_s8, %s4507_s6  ;;  %p4513_p4 = scmp.lt.s32.totalorder %s4507_s6, %s4507_s6 }
 0x71a   :  { %v2326_v34 = vpack.c.bf16 %v2324_v33, %v2322_v32 }
 0x71b   :  { %p4514_p5 = por %p4513_p4, %p4512_p3 }
 0x71c   :  { %3100 = vmatprep.mubr.bf16.mxu0 %v2326_v34  ;;  %3143 = vmatprep.mubr.bf16.mxu1 %v2326_v34 }
 0x71d   :  { %3101 = vmatmul.mubr.bf16.vlgmr.msra.gmra.mrb[8].mxu0 %v4977_v21  ;;  %3144 = vmatmul.mubr.bf16.vlgmr.msra.gmra.mrb[16].mxu1 %v4977_v21  ;;  %p4515_p6 = pnand %p4514_p5, %p4508_p2 }
 0x71e   :  { %3155 = vmatpush1.bf16.msra.mxu0 %v4325_v23  ;;  %3814 = vmatpush3.bf16.msra.mxu1 %v4329_v35 }
 0x71f   :  { %3186 = vmatprep.mubr.bf16.mxu0 %v2326_v34  ;;  %3229 = vmatprep.mubr.bf16.mxu1 %v2326_v34 }
 0x720   :  { %3156 = vmatprep.subr.bf16.mxu0 %v4332_v36  ;;  %3815 = vmatprep.subr.bf16.mxu1 %v4333_v37 }
 0x722   :  { %3157 = vmatpush1.bf16.msra.mxu0 %v4330_v38  ;;  %3816 = vmatpush3.bf16.msra.mxu1 %v4334_v43 }
 0x723   :  { %3158 = vmatprep.subr.bf16.mxu0 %v4337_v45  ;;  %3817 = vmatprep.subr.bf16.mxu1 %v4338_v47 }
 0x726   :  { %3159 = vmatpush1.bf16.msra.mxu0 %v4335_v49  ;;  %3818 = vmatpush3.bf16.msra.mxu1 %v4339_v50 }
 0x727   :  { %3160 = vmatprep.subr.bf16.mxu0 %v4342_v52  ;;  %3819 = vmatprep.subr.bf16.mxu1 %v4343_v53 }
 0x72a   :  { %3161 = vmatpush1.bf16.msra.mxu0 %v4340_v54  ;;  %3820 = vmatpush3.bf16.msra.mxu1 %v4344_v55 }
 0x72b   :  { %3162 = vmatprep.subr.bf16.mxu0 %v4347_v56  ;;  %3821 = vmatprep.subr.bf16.mxu1 %v4348_v40 }
 0x72e   :  { %3163 = vmatpush1.bf16.msra.mxu0 %v4345_v57  ;;  %3822 = vmatpush3.bf16.msra.mxu1 %v4349_v42 }
 0x72f   :  { %3164 = vmatprep.subr.bf16.mxu0 %v4352_v26  ;;  %3823 = vmatprep.subr.bf16.mxu1 %v4353_v22 }
 0x732   :  { %3165 = vmatpush1.bf16.msra.mxu0 %v4350_v58  ;;  %3824 = vmatpush3.bf16.msra.mxu1 %v4354_v11 }
 0x733   :  { %3166 = vmatprep.subr.bf16.mxu0 %v4357_v59  ;;  %3825 = vmatprep.subr.bf16.mxu1 %v4358_v61 }
 0x736   :  { %3167 = vmatpush1.bf16.msra.mxu0 %v4355_v62  ;;  %3826 = vmatpush3.bf16.msra.mxu1 %v4359_v27 }
 0x737   :  { %3168 = vmatprep.subr.bf16.mxu0 %v4362_v63  ;;  %3827 = vmatprep.subr.bf16.mxu1 %v4363_v0 }
 0x73a   :  { %3169 = vmatpush1.bf16.msra.mxu0 %v4360_v1  ;;  %3828 = vmatpush3.bf16.msra.mxu1 %v4364_v13  ;;  %v2483_v13 = vsub.s32 6, %v4775_v19 }
 0x73b   :  { %3170 = vmatprep.subr.bf16.mxu0 %v4367_v2 }
 0x73d   :  { %3230 = vmatmul.mubr.bf16.vlgmr.msra.gmra.mrb[20].mxu1 %v4977_v21 }
 0x73e   :  { %3171 = vmatpush1.bf16.msra.mxu0 %v4365_v4 }
 0x73f   :  { %3172 = vmatprep.subr.bf16.mxu0 %v4370_v60 }
 0x742   :  { %3173 = vmatpush1.bf16.msra.mxu0 %v4368_v5 }
 0x743   :  { %3174 = vmatprep.subr.bf16.mxu0 %v4373_v6 }
 0x746   :  { %3175 = vmatpush1.bf16.msra.mxu0 %v4371_v17  ;;  %v2484_v17 = vrot.slane %v4986_v14, %v2483_v13 }
 0x747   :  { %3176 = vmatprep.subr.bf16.mxu0 %v4376_v7 }
 0x74a   :  { %3177 = vmatpush1.bf16.msra.mxu0 %v4374_v8 }
 0x74b   :  { %3178 = vmatprep.subr.bf16.mxu0 %v4379_v44 }
 0x74e   :  { %3179 = vmatpush1.bf16.msra.mxu0 %v4377_v46 }
 0x74f   :  { %3180 = vmatprep.subr.bf16.mxu0 %v4382_v9 }
 0x752   :  { %3181 = vmatpush1.bf16.msra.mxu0 %v4380_v51 }
 0x753   :  { %3182 = vmatprep.subr.bf16.mxu0 %v4385_v3 }
 0x756   :  { %3183 = vmatpush1.bf16.msra.mxu0 %v4383_v48 }
 0x757   :  { %3184 = vmatprep.subr.bf16.mxu0 %v4388_v10 }
 0x75a   :  { %3185 = vmatpush1.bf16.msra.mxu0 %v4386_v12 }
 0x75d   :  { %3187 = vmatmul.mubr.bf16.vlgmr.msra.gmra.mrb[12].mxu0 %v4977_v21 }
 0x7f0   :  { %v3102_v28 = vpop.f32.mrb[8].mxu0  ;;  %v3145_v29 = vpop.f32.mrb[16].mxu1 }
 0x7f1   :  { %v3103_v30 = vadd.f32 %v3102_v28, %v2460_v15  ;;  %v3146_v31 = vadd.f32 %v3145_v29, %v2468_v16  ;;  %v3104_v32 = vpop.f32.mrb[9].mxu0  ;;  %v3147_v33 = vpop.f32.mrb[17].mxu1 }
 0x7f2   :  { %v3105_v21 = vadd.f32 %v3104_v32, %v2464_v18  ;;  %v3148_v34 = vadd.f32 %v3147_v33, %v2472_v25  ;;  %v3106_v20 = vpop.f32.mrb[10].mxu0  ;;  %v3149_v23 = vpop.f32.mrb[18].mxu1 }
 0x7f3   :  { %v3755_v35 = vmul.f32 -1.442695, %v3103_v30  ;;  %v3757_v36 = vmul.f32 -1.442695, %v3146_v31  ;;  %v3107_v39 = vadd.f32 %v3106_v20, %v2460_v15  ;;  %v3150_v37 = vadd.f32 %v3149_v23, %v2468_v16  ;;  %v3108_v38 = vpop.f32.mrb[11].mxu0  ;;  %v3151_v24 = vpop.f32.mrb[19].mxu1 }
 0x7f4   :  { %v3756_v43 = vmul.f32 -1.442695, %v3105_v21  ;;  %v3758_v45 = vmul.f32 -1.442695, %v3148_v34  ;;  %v3109_v47 = vadd.f32 %v3108_v38, %v2464_v18  ;;  %v3152_v41 = vadd.f32 %v3151_v24, %v2472_v25 }
 0x7f5   :  { %4407 = vpow2.f32 %v3755_v35  ;;  %v3762_v49 = vmul.f32 -1.442695, %v3107_v39  ;;  %v3764_v50 = vmul.f32 -1.442695, %v3150_v37  ;;  %v2475_v30 = vsub.s32 4, %v4775_v19 }
 0x7f6   :  { %4409 = vpow2.f32 %v3757_v36  ;;  %v3763_v52 = vmul.f32 -1.442695, %v3109_v47  ;;  %v3765_v53 = vmul.f32 -1.442695, %v3152_v41  ;;  %v2479_v31 = vsub.s32 5, %v4775_v19 }
 0x7f7   :  { %4411 = vpow2.f32 %v3756_v43  ;;  %v2476_v32 = vrot.slane %v4986_v14, %v2475_v30 }
 0x7f8   :  { %4413 = vpow2.f32 %v3758_v45  ;;  %v2480_v33 = vrot.slane %v4986_v14, %v2479_v31 }
 0x7f9   :  { %4415 = vpow2.f32 %v3762_v49 }
 0x7fa   :  { %4417 = vpow2.f32 %v3764_v50 }
 0x7fb   :  { %4419 = vpow2.f32 %v3763_v52 }
 0x7fc   :  { %4421 = vpow2.f32 %v3765_v53 }
 0x7ff   :  { %v4408_v54 = vpop.eup %4407 }
 0x800   :  { %v4410_v55 = vpop.eup %4409  ;;  %v3280_v56 = vadd.f32 1.0, %v4408_v54 }
 0x801   :  { %v4412_v40 = vpop.eup %4411  ;;  %v3282_v57 = vadd.f32 1.0, %v4410_v55 }
 0x802   :  { %v4414_v42 = vpop.eup %4413  ;;  %4423 = vrcp.f32 %v3280_v56  ;;  %v3281_v26 = vadd.f32 1.0, %v4412_v40 }
 0x803   :  { %v4416_v22 = vpop.eup %4415  ;;  %4425 = vrcp.f32 %v3282_v57  ;;  %v3283_v58 = vadd.f32 1.0, %v4414_v42 }
 0x804   :  { %v4418_v11 = vpop.eup %4417  ;;  %4427 = vrcp.f32 %v3281_v26  ;;  %v3287_v59 = vadd.f32 1.0, %v4416_v22 }
 0x805   :  { %v4420_v61 = vpop.eup %4419  ;;  %4429 = vrcp.f32 %v3283_v58  ;;  %v3289_v62 = vadd.f32 1.0, %v4418_v11 }
 0x806   :  { %v4422_v27 = vpop.eup %4421  ;;  %4431 = vrcp.f32 %v3287_v59  ;;  %v3288_v63 = vadd.f32 1.0, %v4420_v61 }
 0x807   :  { %4433 = vrcp.f32 %v3289_v62  ;;  %v3290_v0 = vadd.f32 1.0, %v4422_v27 }
 0x808   :  { %4435 = vrcp.f32 %v3288_v63 }
 0x809   :  { %4437 = vrcp.f32 %v3290_v0 }
 0x80c   :  { %v4424_v1 = vpop.eup %4423 }
 0x80d   :  { %v4426_v2 = vpop.eup %4425  ;;  %3322 = vst [vmem:[#allocation8] sm:$0xff] %v4424_v1 }
 0x80e   :  { %v4428_v4 = vpop.eup %4427  ;;  %3324 = vst [vmem:[#allocation8 + $0x10] sm:$0xff] %v4426_v2 }
 0x80f   :  { %v4430_v60 = vpop.eup %4429  ;;  %3323 = vst [vmem:[#allocation8 + $0x8] sm:$0xff] %v4428_v4 }
 0x810   :  { %v4432_v5 = vpop.eup %4431  ;;  %3325 = vst [vmem:[#allocation8 + $0x18] sm:$0xff] %v4430_v60  ;;  %v3829_v6 = vpop.f32.mrb[20].mxu1 }
 0x811   :  { %v4434_v7 = vpop.eup %4433  ;;  %3329 = vst [vmem:[#allocation8 + $0x38] sm:$0xff] %v4432_v5  ;;  %v3830_v8 = vpop.f32.mrb[21].mxu1 }
 0x812   :  { %v4436_v44 = vpop.eup %4435  ;;  %3331 = vst [vmem:[#allocation8 + $0x48] sm:$0xff] %v4434_v7  ;;  %v3831_v46 = vadd.f32 %v3830_v8, %v3829_v6  ;;  %v3832_v9 = vpop.f32.mrb[22].mxu1 }
 0x813   :  { %v4438_v51 = vpop.eup %4437  ;;  %3330 = vst [vmem:[#allocation8 + $0x40] sm:$0xff] %v4436_v44  ;;  %v3833_v3 = vpop.f32.mrb[23].mxu1 }
 0x814   :  { %3332 = vst [vmem:[#allocation8 + $0x50] sm:$0xff] %v4438_v51  ;;  %v3232_v48 = vadd.f32 %v3831_v46, %v2484_v17  ;;  %v3834_v10 = vadd.f32 %v3833_v3, %v3832_v9 }
 0x816   :  { %v3761_v12 = vmul.f32 -1.442695, %v3232_v48  ;;  %v3235_v15 = vadd.f32 %v3834_v10, %v2484_v17 }
 0x818   :  { %4439 = vpow2.f32 %v3761_v12  ;;  %v3768_v16 = vmul.f32 -1.442695, %v3235_v15 }
 0x81a   :  { %4441 = vpow2.f32 %v3768_v16 }
 0x822   :  { %v4440_v18 = vpop.eup %4439 }
 0x823   :  { %v3286_v25 = vadd.f32 1.0, %v4440_v18 }
 0x824   :  { %v4442_v28 = vpop.eup %4441 }
 0x825   :  { %4443 = vrcp.f32 %v3286_v25  ;;  %v3293_v29 = vadd.f32 1.0, %v4442_v28 }
 0x827   :  { %4445 = vrcp.f32 %v3293_v29 }
 0x82f   :  { %v4444_v21 = vpop.eup %4443 }
 0x830   :  { %3328 = vst [vmem:[#allocation8 + $0x30] sm:$0xff] %v4444_v21  ;;  %v3188_v34 = vpop.f32.mrb[12].mxu0 }
 0x831   :  { %v4446_v20 = vpop.eup %4445  ;;  %v3189_v23 = vadd.f32 %v3188_v34, %v2476_v32  ;;  %v3190_v35 = vpop.f32.mrb[13].mxu0 }
 0x832   :  { %3335 = vst [vmem:[#allocation8 + $0x68] sm:$0xff] %v4446_v20  ;;  %v3191_v36 = vadd.f32 %v3190_v35, %v2480_v33  ;;  %v3192_v39 = vpop.f32.mrb[14].mxu0 }
 0x833   :  { %v3759_v37 = vmul.f32 -1.442695, %v3189_v23  ;;  %v3193_v38 = vadd.f32 %v3192_v39, %v2476_v32  ;;  %v3194_v24 = vpop.f32.mrb[15].mxu0 }
 0x834   :  { %v3760_v43 = vmul.f32 -1.442695, %v3191_v36  ;;  %v3195_v45 = vadd.f32 %v3194_v24, %v2480_v33 }
 0x835   :  { %4447 = vpow2.f32 %v3759_v37  ;;  %v3766_v19 = vmul.f32 -1.442695, %v3193_v38 }
 0x836   :  { %4449 = vpow2.f32 %v3760_v43  ;;  %v3767_v47 = vmul.f32 -1.442695, %v3195_v45 }
 0x837   :  { %4451 = vpow2.f32 %v3766_v19 }
 0x838   :  { %4453 = vpow2.f32 %v3767_v47 }
 0x83f   :  { %v4448_v14 = vpop.eup %4447 }
 0x840   :  { %v4450_v41 = vpop.eup %4449  ;;  %v3284_v49 = vadd.f32 1.0, %v4448_v14 }
 0x841   :  { %v4452_v50 = vpop.eup %4451  ;;  %v3285_v52 = vadd.f32 1.0, %v4450_v41 }
 0x842   :  { %v4454_v53 = vpop.eup %4453  ;;  %4455 = vrcp.f32 %v3284_v49  ;;  %v3291_v54 = vadd.f32 1.0, %v4452_v50 }
 0x843   :  { %4457 = vrcp.f32 %v3285_v52  ;;  %v3292_v55 = vadd.f32 1.0, %v4454_v53 }
 0x844   :  { %4459 = vrcp.f32 %v3291_v54 }
 0x845   :  { %4461 = vrcp.f32 %v3292_v55 }
 0x84c   :  { %v4456_v56 = vpop.eup %4455 }
 0x84d   :  { %v4458_v40 = vpop.eup %4457  ;;  %3326 = vst [vmem:[#allocation8 + $0x20] sm:$0xff] %v4456_v56 }
 0x84e   :  { %v4460_v57 = vpop.eup %4459  ;;  %3327 = vst [vmem:[#allocation8 + $0x28] sm:$0xff] %v4458_v40 }
 0x84f   :  { %v4462_v42 = vpop.eup %4461  ;;  %3333 = vst [vmem:[#allocation8 + $0x58] sm:$0xff] %v4460_v57 }
 0x850   :  { %3334 = vst [vmem:[#allocation8 + $0x60] sm:$0xff] %v4462_v42 }
 0x851   :  { %4518 = shalt.err (!%p4515_p6)
}
 0x852   :  { %s4519_s22 = scalar_lea.hbm %s5031_s15, 1792 }
 0x853   :  { %p4520_p7 = scmp.ne.s32.totalorder %s5031_s15, %s4519_s22  ;;  %p4523_p8 = scmp.lt.u32.totalorder %s4519_s22, %s5031_s15 }
 0x855   :  { %p4525_p9 = pnand %p4523_p8, %p4520_p7 }
 0x857   :  { %4528 = shalt.err (!%p4525_p9)
}
 0x858   :  { %s4547_s3 = smov 896   ;;  %s4548_s9 = smov 56  }
 0x859   :  { %3387 = dma.vmem_to_hbm [thread:$0]  %s3382_s8, 1792, %s5031_s15, [#allocation5], %s4547_s3, %s4547_s3, %s4548_s9  }
 0x85a   :  { %4533 = dma.done.wait [#allocation5], 1792  }
 0x85b   :  { %4534 = vsyncadd [#allocation5], 4294965504 }
 0x85c   :  { %3395 = vsyncpa [#allocation4], 1 }
 0x85d   :  { %3396 = vsyncpa [#allocation7], 1 }
 0x85e   :  { %3397 = vsyncpa [#allocation5], 1 }

</bundles_post_ra>
